<compile_context>
chip_gen: v7x
topology: tpu7x:2x2x1
jax: 0.10.0
libtpu: 0.0.40
codegen_flags: <defaults>
</compile_context>

<pallas_src>
import functools

import jax
import jax.numpy as jnp
import numpy as np
from jax.experimental import pallas as pl
from jax.experimental.pallas import tpu as pltpu


def _round_up(a, m):
    return (a + m - 1) // m * m


def _pad_gate_cols(w, H, Hp):
    """Pad each of the 4 stacked gate blocks (width H, order i,f,g,o) to width Hp."""
    r = w.shape[0]
    w4 = w.reshape(r, 4, H)
    w4 = jnp.pad(w4, ((0, 0), (0, 0), (0, Hp - H)))
    return w4.reshape(r, 4 * Hp)


def _vmem_budget_bytes():
    """Generation-aware VMEM budget: ~3/4 of physical per-core VMEM
    (~48 MiB on v7x's 64 MiB, ~96 MiB on v5e/v6e's 128 MiB)."""
    try:
        cap = int(pltpu.get_tpu_info().vmem_capacity_bytes)
        if cap <= 0:
            raise ValueError("bad vmem capacity")
    except Exception:
        cap = 64 * 1024 * 1024          # conservative fallback = v7x per-core VMEM
    return max(32 * 1024 * 1024, (cap * 3) // 4)


def _pick_batch_tile(B, T, D, Hp, Cp, vmem_budget):
    """Choose the batch tile TB (multiple of 8) and padded batch size B_pad."""
    G = 4 * Hp
    per_row = (2 * T * D * 4        # double-buffered x block (f32)
               + T * G * 4          # hoisted forward-direction projection (f32)
               + 10 * G * 4         # gate/state temporaries + slack
               + 2 * Cp * 4)        # double-buffered output block
    weight_bytes = 2 * (2 * D * G * 2 + Hp * G * 2 + 2 * Hp * Cp * 2
                        + 2 * G * 4 + Cp * 4)          # double-buffered weights/biases
    avail = vmem_budget - weight_bytes - (2 << 20)
    tb_cap = max(8, (avail // per_row) // 8 * 8) if avail > 8 * per_row else 8
    TB = min(128, tb_cap)           # 128-row cap bounds vreg pressure in the unrolled loop
    B8 = _round_up(B, 8)
    if TB >= B8:
        # One tile would cover the whole (padded) batch; if the batch is big enough, split
        # so the grid has >= 2 steps and v7x's second TensorCore is used.
        TB = B8 if B8 < 16 else _round_up(B8 // 2, 8)
    B_pad = _round_up(B8, TB)
    return TB, B_pad


def bilstm_kernel(x_ref,       # (T, TB, D)  f32, time-major batch tile
                  wih_f_ref,   # (D, 4Hp)    bf16, forward input weights (gate-padded)
                  wih_b_ref,   # (D, 4Hp)    bf16, backward input weights (gate-padded)
                  b_f_ref,     # (1, 4Hp)    f32, pre-summed forward biases
                  b_b_ref,     # (1, 4Hp)    f32, pre-summed backward biases
                  whh_ref,     # (Hp, 4Hp)   bf16, forward recurrent weights
                  wfc_f_ref,   # (Hp, Cp)    bf16
                  wfc_b_ref,   # (Hp, Cp)    bf16
                  bfc_ref,     # (1, Cp)     f32
                  out_ref,     # (TB, Cp)    f32, lane-dense
                  *, T, TB, Hp):
    D = x_ref.shape[2]

    # Hoisted forward-direction input projection for ALL time steps: ONE MXU matmul,
    # bias folded in.  x is f32 so the leading-dim collapse (T, TB, D) -> (T*TB, D) is an
    # aligned-sublane relabel for any TB multiple of 8; cast to bf16 afterwards for the MXU.
    x2 = x_ref[...].reshape(T * TB, D).astype(jnp.bfloat16)              # (T*TB, D)
    xw_f = (jnp.dot(x2, wih_f_ref[...], preferred_element_type=jnp.float32)
            + b_f_ref[...])                                              # (T*TB, 4Hp) f32

    # Forward recurrence: the serial chain per step is only h @ W_hh on the MXU.
    # Static Python loop (T is static & short) => static, sublane-aligned slices of xw_f.
    h = jnp.zeros((TB, Hp), jnp.float32)
    c = jnp.zeros((TB, Hp), jnp.float32)
    for t in range(T):
        rec = jnp.dot(h.astype(jnp.bfloat16), whh_ref[...],
                      preferred_element_type=jnp.float32)                # (TB, 4Hp) f32
        r0 = t * TB
        i = jax.nn.sigmoid(xw_f[r0:r0 + TB, 0 * Hp:1 * Hp] + rec[:, 0 * Hp:1 * Hp])
        f = jax.nn.sigmoid(xw_f[r0:r0 + TB, 1 * Hp:2 * Hp] + rec[:, 1 * Hp:2 * Hp])
        g = jnp.tanh(xw_f[r0:r0 + TB, 2 * Hp:3 * Hp] + rec[:, 2 * Hp:3 * Hp])
        o = jax.nn.sigmoid(xw_f[r0:r0 + TB, 3 * Hp:4 * Hp] + rec[:, 3 * Hp:4 * Hp])
        c = f * c + i * g
        h = o * jnp.tanh(c)

    # Backward direction of out[:, -1, :]: one step on x[:, T-1, :] from zero state.
    # h0 == 0 => no recurrent term; c0 == 0 => forget gate irrelevant.  Only the last
    # time step is projected for this direction.
    xw_b = (jnp.dot(x2[(T - 1) * TB:T * TB, :], wih_b_ref[...],
                    preferred_element_type=jnp.float32)
            + b_b_ref[...])                                              # (TB, 4Hp) f32
    ib = jax.nn.sigmoid(xw_b[:, 0 * Hp:1 * Hp])
    gb = jnp.tanh(xw_b[:, 2 * Hp:3 * Hp])
    ob = jax.nn.sigmoid(xw_b[:, 3 * Hp:4 * Hp])
    h_bwd = ob * jnp.tanh(ib * gb)

    # Final Linear: two dots + bias, written as a lane-dense (TB, Cp) block.
    out_ref[...] = (jnp.dot(h.astype(jnp.bfloat16), wfc_f_ref[...],
                            preferred_element_type=jnp.float32)
                    + jnp.dot(h_bwd.astype(jnp.bfloat16), wfc_b_ref[...],
                              preferred_element_type=jnp.float32)
                    + bfc_ref[...])


def bilstm_forward(x, params):
    """x: (B, T, D) float32 (PyTorch batch_first layout). Returns (B, C) float32."""
    B, T, D = x.shape
    H = params["whh_f"].shape[0]
    C = params["wfc"].shape[1]
    Hp = _round_up(H, 128)          # lane-aligned gate width
    Cp = _round_up(C, 128)          # lane-dense output width
    G = 4 * Hp

    # --- weight prep (gate-block padding / bf16 cast), once, outside the kernel ---
    wih_f = _pad_gate_cols(params["wih_f"], H, Hp).astype(jnp.bfloat16)        # (D, 4Hp)
    wih_b = _pad_gate_cols(params["wih_b"], H, Hp).astype(jnp.bfloat16)        # (D, 4Hp)
    b_f = _pad_gate_cols(params["b_f"], H, Hp).astype(jnp.float32)             # (1, 4Hp)
    b_b = _pad_gate_cols(params["b_b"], H, Hp).astype(jnp.float32)             # (1, 4Hp)
    whh = jnp.pad(_pad_gate_cols(params["whh_f"], H, Hp),
                  ((0, Hp - H), (0, 0))).astype(jnp.bfloat16)                  # (Hp, 4Hp)
    # NOTE: whh_b is not needed: the backward half of out[:, -1, :] starts from zero state.
    wfc = params["wfc"]
    wfc_f = jnp.pad(wfc[:H], ((0, Hp - H), (0, Cp - C))).astype(jnp.bfloat16)  # (Hp, Cp)
    wfc_b = jnp.pad(wfc[H:], ((0, Hp - H), (0, Cp - C))).astype(jnp.bfloat16)  # (Hp, Cp)
    bfc = jnp.pad(params["bfc"].astype(jnp.float32), ((0, 0), (0, Cp - C)))    # (1, Cp)

    vmem_budget = _vmem_budget_bytes()
    TB, B_pad = _pick_batch_tile(B, T, D, Hp, Cp, vmem_budget)
    grid = (B_pad // TB,)

    # Time-major input (tiny tensor): removes the in-kernel batch->time scatter + scratch.
    x_tm = jnp.transpose(x.astype(jnp.float32), (1, 0, 2))                     # (T, B, D)
    if B_pad != B:
        x_tm = jnp.pad(x_tm, ((0, 0), (0, B_pad - B), (0, 0)))                 # (T, B_pad, D)

    kernel = functools.partial(bilstm_kernel, T=T, TB=TB, Hp=Hp)

    flops = (2 * B_pad * T * D * G          # forward input projection (all steps)
             + 2 * B_pad * D * G            # backward input projection (last step only)
             + 2 * B_pad * T * Hp * G       # recurrent matmuls
             + 2 * B_pad * 2 * Hp * Cp)     # final linear
    transcendentals = 5 * B_pad * T * Hp + 5 * B_pad * Hp
    bytes_accessed = (x_tm.size * 4 + B_pad * Cp * 4
                      + (wih_f.size + wih_b.size + whh.size
                         + wfc_f.size + wfc_b.size) * 2
                      + (b_f.size + b_b.size + bfc.size) * 4)   # weights DMA'd once (const maps)

    out = pl.pallas_call(
        kernel,
        out_shape=jax.ShapeDtypeStruct((B_pad, Cp), jnp.float32),
        grid=grid,
        in_specs=[
            pl.BlockSpec((T, TB, D), lambda b: (0, b, 0)),     # time-major x, batch-tiled
            pl.BlockSpec(wih_f.shape, lambda b: (0, 0)),
            pl.BlockSpec(wih_b.shape, lambda b: (0, 0)),
            pl.BlockSpec(b_f.shape, lambda b: (0, 0)),
            pl.BlockSpec(b_b.shape, lambda b: (0, 0)),
            pl.BlockSpec(whh.shape, lambda b: (0, 0)),
            pl.BlockSpec(wfc_f.shape, lambda b: (0, 0)),
            pl.BlockSpec(wfc_b.shape, lambda b: (0, 0)),
            pl.BlockSpec(bfc.shape, lambda b: (0, 0)),
        ],
        out_specs=pl.BlockSpec((TB, Cp), lambda b: (b, 0)),
        compiler_params=pltpu.CompilerParams(
            dimension_semantics=("parallel",),
            vmem_limit_bytes=int(vmem_budget),
        ),
        cost_estimate=pl.CostEstimate(flops=flops,
                                      transcendentals=transcendentals,
                                      bytes_accessed=bytes_accessed),
    )(x_tm, wih_f, wih_b, b_f, b_b, whh, wfc_f, wfc_b, bfc)

    return out[:B, :C]


def init_params(key, input_size, hidden_size, num_classes):
    """Deterministic synthetic init, PyTorch-style U(-1/sqrt(H), 1/sqrt(H)).

    Weights stored pre-transposed for right-multiplication:
      wih_*: (D, 4H), whh_*: (H, 4H), wfc: (2H, C).  Gate order (i, f, g, o).
    Bias pairs (b_ih + b_hh) are pre-summed into one (1, 4H) bias per direction.
    """
    D, H, C = input_size, hidden_size, num_classes
    k = 1.0 / np.sqrt(H)
    keys = jax.random.split(key, 10)
    u = lambda kk, shape: jax.random.uniform(kk, shape, jnp.float32, -k, k)
    return {
        "wih_f": u(keys[0], (D, 4 * H)),
        "whh_f": u(keys[1], (H, 4 * H)),
        "b_f":   u(keys[2], (1, 4 * H)) + u(keys[3], (1, 4 * H)),
        "wih_b": u(keys[4], (D, 4 * H)),
        "whh_b": u(keys[5], (H, 4 * H)),   # unused by out[:, -1, :] (zero initial state)
        "b_b":   u(keys[6], (1, 4 * H)) + u(keys[7], (1, 4 * H)),
        "wfc":   u(keys[8], (2 * H, C)),
        "bfc":   jnp.zeros((1, C), jnp.float32),
    }


def bilstm_reference(x, params):
    """Pure-JAX f32 reference of the PyTorch forward pass (for a loose sanity check)."""
    B, T, D = x.shape
    H = params["whh_f"].shape[0]

    def cell(xt, h, c, wih, whh, b):
        gates = xt @ wih + h @ whh + b
        i = jax.nn.sigmoid(gates[:, :H])
        f = jax.nn.sigmoid(gates[:, H:2 * H])
        g = jnp.tanh(gates[:, 2 * H:3 * H])
        o = jax.nn.sigmoid(gates[:, 3 * H:])
        c = f * c + i * g
        return o * jnp.tanh(c), c

    h = jnp.zeros((B, H), jnp.float32)
    c = jnp.zeros((B, H), jnp.float32)
    for t in range(T):
        h, c = cell(x[:, t, :], h, c, params["wih_f"], params["whh_f"], params["b_f"])
    z = jnp.zeros((B, H), jnp.float32)
    hb, _ = cell(x[:, T - 1, :], z, z, params["wih_b"], params["whh_b"], params["b_b"])
    feat = jnp.concatenate([h, hb], axis=-1)
    return feat @ params["wfc"] + params["bfc"]


if __name__ == "__main__":
    # Module defaults D=63, H=128, C=6; small batch and sequence.
    B, T, D, H, C = 2, 8, 63, 128, 6

    key = jax.random.PRNGKey(0)
    kx, kp = jax.random.split(key)
    x = jax.random.normal(kx, (B, T, D), jnp.float32)
    params = init_params(kp, D, H, C)

    y = bilstm_forward(x, params)
    jax.block_until_ready(y)
    assert y.shape == (B, C) and y.dtype == jnp.float32

    y_ref = bilstm_reference(x, params)
    assert float(jnp.max(jnp.abs(y - y_ref))) < 1e-1  # loose: bf16 MXU operands, f32 accum

    print("KERNEL_OK")
</pallas_src>

<mosaic_0001>
module attributes {stable_mosaic.version = 11 : i64} {
  func.func @bilstm_kernel(%arg0: i32, %arg1: memref<8x8x63xf32, #tpu.memory_space<vmem>>, %arg2: memref<63x512xbf16, #tpu.memory_space<vmem>>, %arg3: memref<63x512xbf16, #tpu.memory_space<vmem>>, %arg4: memref<1x512xf32, #tpu.memory_space<vmem>>, %arg5: memref<1x512xf32, #tpu.memory_space<vmem>>, %arg6: memref<128x512xbf16, #tpu.memory_space<vmem>>, %arg7: memref<128x128xbf16, #tpu.memory_space<vmem>>, %arg8: memref<128x128xbf16, #tpu.memory_space<vmem>>, %arg9: memref<1x128xf32, #tpu.memory_space<vmem>>, %arg10: memref<8x128xf32, #tpu.memory_space<vmem>>) attributes {dimension_semantics = [#tpu.dimension_semantics<parallel>], iteration_bounds = array<i64: 1>, scalar_prefetch = 0 : i64, scratch_operands = 0 : i64, tpu.core_type = #tpu.core_type<tc>, window_params = [{transform_indices = @transform_0, window_bounds = array<i64: 8, 8, 63>}, {pipeline_mode = #tpu.pipeline_mode<synchronous>, transform_indices = @transform_1, window_bounds = array<i64: 63, 512>}, {pipeline_mode = #tpu.pipeline_mode<synchronous>, transform_indices = @transform_2, window_bounds = array<i64: 63, 512>}, {pipeline_mode = #tpu.pipeline_mode<synchronous>, transform_indices = @transform_3, window_bounds = array<i64: 1, 512>}, {pipeline_mode = #tpu.pipeline_mode<synchronous>, transform_indices = @transform_4, window_bounds = array<i64: 1, 512>}, {pipeline_mode = #tpu.pipeline_mode<synchronous>, transform_indices = @transform_5, window_bounds = array<i64: 128, 512>}, {pipeline_mode = #tpu.pipeline_mode<synchronous>, transform_indices = @transform_6, window_bounds = array<i64: 128, 128>}, {pipeline_mode = #tpu.pipeline_mode<synchronous>, transform_indices = @transform_7, window_bounds = array<i64: 128, 128>}, {pipeline_mode = #tpu.pipeline_mode<synchronous>, transform_indices = @transform_8, window_bounds = array<i64: 1, 128>}, {transform_indices = @transform_9, window_bounds = array<i64: 8, 128>}]} {
    %c0 = arith.constant 0 : index
    %c0_0 = arith.constant 0 : index
    %c0_1 = arith.constant 0 : index
    %0 = vector.load %arg1[%c0, %c0_0, %c0_1] : memref<8x8x63xf32, #tpu.memory_space<vmem>>, vector<8x8x63xf32>
    %1 = vector.shape_cast %0 : vector<8x8x63xf32> to vector<64x63xf32>
    %2 = arith.truncf %1 : vector<64x63xf32> to vector<64x63xbf16>
    %c0_2 = arith.constant 0 : index
    %c0_3 = arith.constant 0 : index
    %3 = vector.load %arg2[%c0_2, %c0_3] : memref<63x512xbf16, #tpu.memory_space<vmem>>, vector<63x512xbf16>
    %cst = arith.constant dense<0.000000e+00> : vector<64x512xf32>
    %4 = tpu.matmul %2, %3, %cst {dimension_numbers = #tpu.dot_dimension_numbers<[1], [0], [0], [1], [0, 0, 1, 1], [], []>} : vector<64x63xbf16>, vector<63x512xbf16>, vector<64x512xf32> -> vector<64x512xf32>
    %c0_4 = arith.constant 0 : index
    %c0_5 = arith.constant 0 : index
    %5 = vector.load %arg4[%c0_4, %c0_5] : memref<1x512xf32, #tpu.memory_space<vmem>>, vector<1x512xf32>
    %6 = vector.broadcast %5 : vector<1x512xf32> to vector<64x512xf32>
    %7 = arith.addf %4, %6 : vector<64x512xf32>
    %cst_6 = arith.constant 0.000000e+00 : f32
    %8 = vector.broadcast %cst_6 : f32 to vector<8x128xf32>
    %cst_7 = arith.constant 0.000000e+00 : f32
    %9 = vector.broadcast %cst_7 : f32 to vector<8x128xf32>
    %10 = arith.truncf %8 : vector<8x128xf32> to vector<8x128xbf16>
    %c0_8 = arith.constant 0 : index
    %c0_9 = arith.constant 0 : index
    %11 = vector.load %arg6[%c0_8, %c0_9] : memref<128x512xbf16, #tpu.memory_space<vmem>>, vector<128x512xbf16>
    %cst_10 = arith.constant dense<0.000000e+00> : vector<8x512xf32>
    %12 = tpu.matmul %10, %11, %cst_10 {dimension_numbers = #tpu.dot_dimension_numbers<[1], [0], [0], [1], [0, 0, 1, 1], [], []>} : vector<8x128xbf16>, vector<128x512xbf16>, vector<8x512xf32> -> vector<8x512xf32>
    %13 = vector.extract_strided_slice %7 {offsets = [0, 0], sizes = [8, 128], strides = [1, 1]} : vector<64x512xf32> to vector<8x128xf32>
    %14 = vector.extract_strided_slice %12 {offsets = [0, 0], sizes = [8, 128], strides = [1, 1]} : vector<8x512xf32> to vector<8x128xf32>
    %15 = arith.addf %13, %14 : vector<8x128xf32>
    %16 = arith.negf %15 : vector<8x128xf32>
    %17 = math.exp %16 : vector<8x128xf32>
    %cst_11 = arith.constant 1.000000e+00 : f32
    %18 = vector.broadcast %cst_11 : f32 to vector<8x128xf32>
    %19 = arith.addf %18, %17 : vector<8x128xf32>
    %20 = arith.divf %18, %19 : vector<8x128xf32>
    %21 = vector.extract_strided_slice %7 {offsets = [0, 128], sizes = [8, 128], strides = [1, 1]} : vector<64x512xf32> to vector<8x128xf32>
    %22 = vector.extract_strided_slice %12 {offsets = [0, 128], sizes = [8, 128], strides = [1, 1]} : vector<8x512xf32> to vector<8x128xf32>
    %23 = arith.addf %21, %22 : vector<8x128xf32>
    %24 = arith.negf %23 : vector<8x128xf32>
    %25 = math.exp %24 : vector<8x128xf32>
    %cst_12 = arith.constant 1.000000e+00 : f32
    %26 = vector.broadcast %cst_12 : f32 to vector<8x128xf32>
    %27 = arith.addf %26, %25 : vector<8x128xf32>
    %28 = arith.divf %26, %27 : vector<8x128xf32>
    %29 = vector.extract_strided_slice %7 {offsets = [0, 256], sizes = [8, 128], strides = [1, 1]} : vector<64x512xf32> to vector<8x128xf32>
    %30 = vector.extract_strided_slice %12 {offsets = [0, 256], sizes = [8, 128], strides = [1, 1]} : vector<8x512xf32> to vector<8x128xf32>
    %31 = arith.addf %29, %30 : vector<8x128xf32>
    %32 = math.tanh %31 : vector<8x128xf32>
    %33 = vector.extract_strided_slice %7 {offsets = [0, 384], sizes = [8, 128], strides = [1, 1]} : vector<64x512xf32> to vector<8x128xf32>
    %34 = vector.extract_strided_slice %12 {offsets = [0, 384], sizes = [8, 128], strides = [1, 1]} : vector<8x512xf32> to vector<8x128xf32>
    %35 = arith.addf %33, %34 : vector<8x128xf32>
    %36 = arith.negf %35 : vector<8x128xf32>
    %37 = math.exp %36 : vector<8x128xf32>
    %cst_13 = arith.constant 1.000000e+00 : f32
    %38 = vector.broadcast %cst_13 : f32 to vector<8x128xf32>
    %39 = arith.addf %38, %37 : vector<8x128xf32>
    %40 = arith.divf %38, %39 : vector<8x128xf32>
    %41 = arith.mulf %28, %9 : vector<8x128xf32>
    %42 = arith.mulf %20, %32 : vector<8x128xf32>
    %43 = arith.addf %41, %42 : vector<8x128xf32>
    %44 = math.tanh %43 : vector<8x128xf32>
    %45 = arith.mulf %40, %44 : vector<8x128xf32>
    %46 = arith.truncf %45 : vector<8x128xf32> to vector<8x128xbf16>
    %c0_14 = arith.constant 0 : index
    %c0_15 = arith.constant 0 : index
    %47 = vector.load %arg6[%c0_14, %c0_15] : memref<128x512xbf16, #tpu.memory_space<vmem>>, vector<128x512xbf16>
    %cst_16 = arith.constant dense<0.000000e+00> : vector<8x512xf32>
    %48 = tpu.matmul %46, %47, %cst_16 {dimension_numbers = #tpu.dot_dimension_numbers<[1], [0], [0], [1], [0, 0, 1, 1], [], []>} : vector<8x128xbf16>, vector<128x512xbf16>, vector<8x512xf32> -> vector<8x512xf32>
    %49 = vector.extract_strided_slice %7 {offsets = [8, 0], sizes = [8, 128], strides = [1, 1]} : vector<64x512xf32> to vector<8x128xf32>
    %50 = vector.extract_strided_slice %48 {offsets = [0, 0], sizes = [8, 128], strides = [1, 1]} : vector<8x512xf32> to vector<8x128xf32>
    %51 = arith.addf %49, %50 : vector<8x128xf32>
    %52 = arith.negf %51 : vector<8x128xf32>
    %53 = math.exp %52 : vector<8x128xf32>
    %cst_17 = arith.constant 1.000000e+00 : f32
    %54 = vector.broadcast %cst_17 : f32 to vector<8x128xf32>
    %55 = arith.addf %54, %53 : vector<8x128xf32>
    %56 = arith.divf %54, %55 : vector<8x128xf32>
    %57 = vector.extract_strided_slice %7 {offsets = [8, 128], sizes = [8, 128], strides = [1, 1]} : vector<64x512xf32> to vector<8x128xf32>
    %58 = vector.extract_strided_slice %48 {offsets = [0, 128], sizes = [8, 128], strides = [1, 1]} : vector<8x512xf32> to vector<8x128xf32>
    %59 = arith.addf %57, %58 : vector<8x128xf32>
    %60 = arith.negf %59 : vector<8x128xf32>
    %61 = math.exp %60 : vector<8x128xf32>
    %cst_18 = arith.constant 1.000000e+00 : f32
    %62 = vector.broadcast %cst_18 : f32 to vector<8x128xf32>
    %63 = arith.addf %62, %61 : vector<8x128xf32>
    %64 = arith.divf %62, %63 : vector<8x128xf32>
    %65 = vector.extract_strided_slice %7 {offsets = [8, 256], sizes = [8, 128], strides = [1, 1]} : vector<64x512xf32> to vector<8x128xf32>
    %66 = vector.extract_strided_slice %48 {offsets = [0, 256], sizes = [8, 128], strides = [1, 1]} : vector<8x512xf32> to vector<8x128xf32>
    %67 = arith.addf %65, %66 : vector<8x128xf32>
    %68 = math.tanh %67 : vector<8x128xf32>
    %69 = vector.extract_strided_slice %7 {offsets = [8, 384], sizes = [8, 128], strides = [1, 1]} : vector<64x512xf32> to vector<8x128xf32>
    %70 = vector.extract_strided_slice %48 {offsets = [0, 384], sizes = [8, 128], strides = [1, 1]} : vector<8x512xf32> to vector<8x128xf32>
    %71 = arith.addf %69, %70 : vector<8x128xf32>
    %72 = arith.negf %71 : vector<8x128xf32>
    %73 = math.exp %72 : vector<8x128xf32>
    %cst_19 = arith.constant 1.000000e+00 : f32
    %74 = vector.broadcast %cst_19 : f32 to vector<8x128xf32>
    %75 = arith.addf %74, %73 : vector<8x128xf32>
    %76 = arith.divf %74, %75 : vector<8x128xf32>
    %77 = arith.mulf %64, %43 : vector<8x128xf32>
    %78 = arith.mulf %56, %68 : vector<8x128xf32>
    %79 = arith.addf %77, %78 : vector<8x128xf32>
    %80 = math.tanh %79 : vector<8x128xf32>
    %81 = arith.mulf %76, %80 : vector<8x128xf32>
    %82 = arith.truncf %81 : vector<8x128xf32> to vector<8x128xbf16>
    %c0_20 = arith.constant 0 : index
    %c0_21 = arith.constant 0 : index
    %83 = vector.load %arg6[%c0_20, %c0_21] : memref<128x512xbf16, #tpu.memory_space<vmem>>, vector<128x512xbf16>
    %cst_22 = arith.constant dense<0.000000e+00> : vector<8x512xf32>
    %84 = tpu.matmul %82, %83, %cst_22 {dimension_numbers = #tpu.dot_dimension_numbers<[1], [0], [0], [1], [0, 0, 1, 1], [], []>} : vector<8x128xbf16>, vector<128x512xbf16>, vector<8x512xf32> -> vector<8x512xf32>
    %85 = vector.extract_strided_slice %7 {offsets = [16, 0], sizes = [8, 128], strides = [1, 1]} : vector<64x512xf32> to vector<8x128xf32>
    %86 = vector.extract_strided_slice %84 {offsets = [0, 0], sizes = [8, 128], strides = [1, 1]} : vector<8x512xf32> to vector<8x128xf32>
    %87 = arith.addf %85, %86 : vector<8x128xf32>
    %88 = arith.negf %87 : vector<8x128xf32>
    %89 = math.exp %88 : vector<8x128xf32>
    %cst_23 = arith.constant 1.000000e+00 : f32
    %90 = vector.broadcast %cst_23 : f32 to vector<8x128xf32>
    %91 = arith.addf %90, %89 : vector<8x128xf32>
    %92 = arith.divf %90, %91 : vector<8x128xf32>
    %93 = vector.extract_strided_slice %7 {offsets = [16, 128], sizes = [8, 128], strides = [1, 1]} : vector<64x512xf32> to vector<8x128xf32>
    %94 = vector.extract_strided_slice %84 {offsets = [0, 128], sizes = [8, 128], strides = [1, 1]} : vector<8x512xf32> to vector<8x128xf32>
    %95 = arith.addf %93, %94 : vector<8x128xf32>
    %96 = arith.negf %95 : vector<8x128xf32>
    %97 = math.exp %96 : vector<8x128xf32>
    %cst_24 = arith.constant 1.000000e+00 : f32
    %98 = vector.broadcast %cst_24 : f32 to vector<8x128xf32>
    %99 = arith.addf %98, %97 : vector<8x128xf32>
    %100 = arith.divf %98, %99 : vector<8x128xf32>
    %101 = vector.extract_strided_slice %7 {offsets = [16, 256], sizes = [8, 128], strides = [1, 1]} : vector<64x512xf32> to vector<8x128xf32>
    %102 = vector.extract_strided_slice %84 {offsets = [0, 256], sizes = [8, 128], strides = [1, 1]} : vector<8x512xf32> to vector<8x128xf32>
    %103 = arith.addf %101, %102 : vector<8x128xf32>
    %104 = math.tanh %103 : vector<8x128xf32>
    %105 = vector.extract_strided_slice %7 {offsets = [16, 384], sizes = [8, 128], strides = [1, 1]} : vector<64x512xf32> to vector<8x128xf32>
    %106 = vector.extract_strided_slice %84 {offsets = [0, 384], sizes = [8, 128], strides = [1, 1]} : vector<8x512xf32> to vector<8x128xf32>
    %107 = arith.addf %105, %106 : vector<8x128xf32>
    %108 = arith.negf %107 : vector<8x128xf32>
    %109 = math.exp %108 : vector<8x128xf32>
    %cst_25 = arith.constant 1.000000e+00 : f32
    %110 = vector.broadcast %cst_25 : f32 to vector<8x128xf32>
    %111 = arith.addf %110, %109 : vector<8x128xf32>
    %112 = arith.divf %110, %111 : vector<8x128xf32>
    %113 = arith.mulf %100, %79 : vector<8x128xf32>
    %114 = arith.mulf %92, %104 : vector<8x128xf32>
    %115 = arith.addf %113, %114 : vector<8x128xf32>
    %116 = math.tanh %115 : vector<8x128xf32>
    %117 = arith.mulf %112, %116 : vector<8x128xf32>
    %118 = arith.truncf %117 : vector<8x128xf32> to vector<8x128xbf16>
    %c0_26 = arith.constant 0 : index
    %c0_27 = arith.constant 0 : index
    %119 = vector.load %arg6[%c0_26, %c0_27] : memref<128x512xbf16, #tpu.memory_space<vmem>>, vector<128x512xbf16>
    %cst_28 = arith.constant dense<0.000000e+00> : vector<8x512xf32>
    %120 = tpu.matmul %118, %119, %cst_28 {dimension_numbers = #tpu.dot_dimension_numbers<[1], [0], [0], [1], [0, 0, 1, 1], [], []>} : vector<8x128xbf16>, vector<128x512xbf16>, vector<8x512xf32> -> vector<8x512xf32>
    %121 = vector.extract_strided_slice %7 {offsets = [24, 0], sizes = [8, 128], strides = [1, 1]} : vector<64x512xf32> to vector<8x128xf32>
    %122 = vector.extract_strided_slice %120 {offsets = [0, 0], sizes = [8, 128], strides = [1, 1]} : vector<8x512xf32> to vector<8x128xf32>
    %123 = arith.addf %121, %122 : vector<8x128xf32>
    %124 = arith.negf %123 : vector<8x128xf32>
    %125 = math.exp %124 : vector<8x128xf32>
    %cst_29 = arith.constant 1.000000e+00 : f32
    %126 = vector.broadcast %cst_29 : f32 to vector<8x128xf32>
    %127 = arith.addf %126, %125 : vector<8x128xf32>
    %128 = arith.divf %126, %127 : vector<8x128xf32>
    %129 = vector.extract_strided_slice %7 {offsets = [24, 128], sizes = [8, 128], strides = [1, 1]} : vector<64x512xf32> to vector<8x128xf32>
    %130 = vector.extract_strided_slice %120 {offsets = [0, 128], sizes = [8, 128], strides = [1, 1]} : vector<8x512xf32> to vector<8x128xf32>
    %131 = arith.addf %129, %130 : vector<8x128xf32>
    %132 = arith.negf %131 : vector<8x128xf32>
    %133 = math.exp %132 : vector<8x128xf32>
    %cst_30 = arith.constant 1.000000e+00 : f32
    %134 = vector.broadcast %cst_30 : f32 to vector<8x128xf32>
    %135 = arith.addf %134, %133 : vector<8x128xf32>
    %136 = arith.divf %134, %135 : vector<8x128xf32>
    %137 = vector.extract_strided_slice %7 {offsets = [24, 256], sizes = [8, 128], strides = [1, 1]} : vector<64x512xf32> to vector<8x128xf32>
    %138 = vector.extract_strided_slice %120 {offsets = [0, 256], sizes = [8, 128], strides = [1, 1]} : vector<8x512xf32> to vector<8x128xf32>
    %139 = arith.addf %137, %138 : vector<8x128xf32>
    %140 = math.tanh %139 : vector<8x128xf32>
    %141 = vector.extract_strided_slice %7 {offsets = [24, 384], sizes = [8, 128], strides = [1, 1]} : vector<64x512xf32> to vector<8x128xf32>
    %142 = vector.extract_strided_slice %120 {offsets = [0, 384], sizes = [8, 128], strides = [1, 1]} : vector<8x512xf32> to vector<8x128xf32>
    %143 = arith.addf %141, %142 : vector<8x128xf32>
    %144 = arith.negf %143 : vector<8x128xf32>
    %145 = math.exp %144 : vector<8x128xf32>
    %cst_31 = arith.constant 1.000000e+00 : f32
    %146 = vector.broadcast %cst_31 : f32 to vector<8x128xf32>
    %147 = arith.addf %146, %145 : vector<8x128xf32>
    %148 = arith.divf %146, %147 : vector<8x128xf32>
    %149 = arith.mulf %136, %115 : vector<8x128xf32>
    %150 = arith.mulf %128, %140 : vector<8x128xf32>
    %151 = arith.addf %149, %150 : vector<8x128xf32>
    %152 = math.tanh %151 : vector<8x128xf32>
    %153 = arith.mulf %148, %152 : vector<8x128xf32>
    %154 = arith.truncf %153 : vector<8x128xf32> to vector<8x128xbf16>
    %c0_32 = arith.constant 0 : index
    %c0_33 = arith.constant 0 : index
    %155 = vector.load %arg6[%c0_32, %c0_33] : memref<128x512xbf16, #tpu.memory_space<vmem>>, vector<128x512xbf16>
    %cst_34 = arith.constant dense<0.000000e+00> : vector<8x512xf32>
    %156 = tpu.matmul %154, %155, %cst_34 {dimension_numbers = #tpu.dot_dimension_numbers<[1], [0], [0], [1], [0, 0, 1, 1], [], []>} : vector<8x128xbf16>, vector<128x512xbf16>, vector<8x512xf32> -> vector<8x512xf32>
    %157 = vector.extract_strided_slice %7 {offsets = [32, 0], sizes = [8, 128], strides = [1, 1]} : vector<64x512xf32> to vector<8x128xf32>
    %158 = vector.extract_strided_slice %156 {offsets = [0, 0], sizes = [8, 128], strides = [1, 1]} : vector<8x512xf32> to vector<8x128xf32>
    %159 = arith.addf %157, %158 : vector<8x128xf32>
    %160 = arith.negf %159 : vector<8x128xf32>
    %161 = math.exp %160 : vector<8x128xf32>
    %cst_35 = arith.constant 1.000000e+00 : f32
    %162 = vector.broadcast %cst_35 : f32 to vector<8x128xf32>
    %163 = arith.addf %162, %161 : vector<8x128xf32>
    %164 = arith.divf %162, %163 : vector<8x128xf32>
    %165 = vector.extract_strided_slice %7 {offsets = [32, 128], sizes = [8, 128], strides = [1, 1]} : vector<64x512xf32> to vector<8x128xf32>
    %166 = vector.extract_strided_slice %156 {offsets = [0, 128], sizes = [8, 128], strides = [1, 1]} : vector<8x512xf32> to vector<8x128xf32>
    %167 = arith.addf %165, %166 : vector<8x128xf32>
    %168 = arith.negf %167 : vector<8x128xf32>
    %169 = math.exp %168 : vector<8x128xf32>
    %cst_36 = arith.constant 1.000000e+00 : f32
    %170 = vector.broadcast %cst_36 : f32 to vector<8x128xf32>
    %171 = arith.addf %170, %169 : vector<8x128xf32>
    %172 = arith.divf %170, %171 : vector<8x128xf32>
    %173 = vector.extract_strided_slice %7 {offsets = [32, 256], sizes = [8, 128], strides = [1, 1]} : vector<64x512xf32> to vector<8x128xf32>
    %174 = vector.extract_strided_slice %156 {offsets = [0, 256], sizes = [8, 128], strides = [1, 1]} : vector<8x512xf32> to vector<8x128xf32>
    %175 = arith.addf %173, %174 : vector<8x128xf32>
    %176 = math.tanh %175 : vector<8x128xf32>
    %177 = vector.extract_strided_slice %7 {offsets = [32, 384], sizes = [8, 128], strides = [1, 1]} : vector<64x512xf32> to vector<8x128xf32>
    %178 = vector.extract_strided_slice %156 {offsets = [0, 384], sizes = [8, 128], strides = [1, 1]} : vector<8x512xf32> to vector<8x128xf32>
    %179 = arith.addf %177, %178 : vector<8x128xf32>
    %180 = arith.negf %179 : vector<8x128xf32>
    %181 = math.exp %180 : vector<8x128xf32>
    %cst_37 = arith.constant 1.000000e+00 : f32
    %182 = vector.broadcast %cst_37 : f32 to vector<8x128xf32>
    %183 = arith.addf %182, %181 : vector<8x128xf32>
    %184 = arith.divf %182, %183 : vector<8x128xf32>
    %185 = arith.mulf %172, %151 : vector<8x128xf32>
    %186 = arith.mulf %164, %176 : vector<8x128xf32>
    %187 = arith.addf %185, %186 : vector<8x128xf32>
    %188 = math.tanh %187 : vector<8x128xf32>
    %189 = arith.mulf %184, %188 : vector<8x128xf32>
    %190 = arith.truncf %189 : vector<8x128xf32> to vector<8x128xbf16>
    %c0_38 = arith.constant 0 : index
    %c0_39 = arith.constant 0 : index
    %191 = vector.load %arg6[%c0_38, %c0_39] : memref<128x512xbf16, #tpu.memory_space<vmem>>, vector<128x512xbf16>
    %cst_40 = arith.constant dense<0.000000e+00> : vector<8x512xf32>
    %192 = tpu.matmul %190, %191, %cst_40 {dimension_numbers = #tpu.dot_dimension_numbers<[1], [0], [0], [1], [0, 0, 1, 1], [], []>} : vector<8x128xbf16>, vector<128x512xbf16>, vector<8x512xf32> -> vector<8x512xf32>
    %193 = vector.extract_strided_slice %7 {offsets = [40, 0], sizes = [8, 128], strides = [1, 1]} : vector<64x512xf32> to vector<8x128xf32>
    %194 = vector.extract_strided_slice %192 {offsets = [0, 0], sizes = [8, 128], strides = [1, 1]} : vector<8x512xf32> to vector<8x128xf32>
    %195 = arith.addf %193, %194 : vector<8x128xf32>
    %196 = arith.negf %195 : vector<8x128xf32>
    %197 = math.exp %196 : vector<8x128xf32>
    %cst_41 = arith.constant 1.000000e+00 : f32
    %198 = vector.broadcast %cst_41 : f32 to vector<8x128xf32>
    %199 = arith.addf %198, %197 : vector<8x128xf32>
    %200 = arith.divf %198, %199 : vector<8x128xf32>
    %201 = vector.extract_strided_slice %7 {offsets = [40, 128], sizes = [8, 128], strides = [1, 1]} : vector<64x512xf32> to vector<8x128xf32>
    %202 = vector.extract_strided_slice %192 {offsets = [0, 128], sizes = [8, 128], strides = [1, 1]} : vector<8x512xf32> to vector<8x128xf32>
    %203 = arith.addf %201, %202 : vector<8x128xf32>
    %204 = arith.negf %203 : vector<8x128xf32>
    %205 = math.exp %204 : vector<8x128xf32>
    %cst_42 = arith.constant 1.000000e+00 : f32
    %206 = vector.broadcast %cst_42 : f32 to vector<8x128xf32>
    %207 = arith.addf %206, %205 : vector<8x128xf32>
    %208 = arith.divf %206, %207 : vector<8x128xf32>
    %209 = vector.extract_strided_slice %7 {offsets = [40, 256], sizes = [8, 128], strides = [1, 1]} : vector<64x512xf32> to vector<8x128xf32>
    %210 = vector.extract_strided_slice %192 {offsets = [0, 256], sizes = [8, 128], strides = [1, 1]} : vector<8x512xf32> to vector<8x128xf32>
    %211 = arith.addf %209, %210 : vector<8x128xf32>
    %212 = math.tanh %211 : vector<8x128xf32>
    %213 = vector.extract_strided_slice %7 {offsets = [40, 384], sizes = [8, 128], strides = [1, 1]} : vector<64x512xf32> to vector<8x128xf32>
    %214 = vector.extract_strided_slice %192 {offsets = [0, 384], sizes = [8, 128], strides = [1, 1]} : vector<8x512xf32> to vector<8x128xf32>
    %215 = arith.addf %213, %214 : vector<8x128xf32>
    %216 = arith.negf %215 : vector<8x128xf32>
    %217 = math.exp %216 : vector<8x128xf32>
    %cst_43 = arith.constant 1.000000e+00 : f32
    %218 = vector.broadcast %cst_43 : f32 to vector<8x128xf32>
    %219 = arith.addf %218, %217 : vector<8x128xf32>
    %220 = arith.divf %218, %219 : vector<8x128xf32>
    %221 = arith.mulf %208, %187 : vector<8x128xf32>
    %222 = arith.mulf %200, %212 : vector<8x128xf32>
    %223 = arith.addf %221, %222 : vector<8x128xf32>
    %224 = math.tanh %223 : vector<8x128xf32>
    %225 = arith.mulf %220, %224 : vector<8x128xf32>
    %226 = arith.truncf %225 : vector<8x128xf32> to vector<8x128xbf16>
    %c0_44 = arith.constant 0 : index
    %c0_45 = arith.constant 0 : index
    %227 = vector.load %arg6[%c0_44, %c0_45] : memref<128x512xbf16, #tpu.memory_space<vmem>>, vector<128x512xbf16>
    %cst_46 = arith.constant dense<0.000000e+00> : vector<8x512xf32>
    %228 = tpu.matmul %226, %227, %cst_46 {dimension_numbers = #tpu.dot_dimension_numbers<[1], [0], [0], [1], [0, 0, 1, 1], [], []>} : vector<8x128xbf16>, vector<128x512xbf16>, vector<8x512xf32> -> vector<8x512xf32>
    %229 = vector.extract_strided_slice %7 {offsets = [48, 0], sizes = [8, 128], strides = [1, 1]} : vector<64x512xf32> to vector<8x128xf32>
    %230 = vector.extract_strided_slice %228 {offsets = [0, 0], sizes = [8, 128], strides = [1, 1]} : vector<8x512xf32> to vector<8x128xf32>
    %231 = arith.addf %229, %230 : vector<8x128xf32>
    %232 = arith.negf %231 : vector<8x128xf32>
    %233 = math.exp %232 : vector<8x128xf32>
    %cst_47 = arith.constant 1.000000e+00 : f32
    %234 = vector.broadcast %cst_47 : f32 to vector<8x128xf32>
    %235 = arith.addf %234, %233 : vector<8x128xf32>
    %236 = arith.divf %234, %235 : vector<8x128xf32>
    %237 = vector.extract_strided_slice %7 {offsets = [48, 128], sizes = [8, 128], strides = [1, 1]} : vector<64x512xf32> to vector<8x128xf32>
    %238 = vector.extract_strided_slice %228 {offsets = [0, 128], sizes = [8, 128], strides = [1, 1]} : vector<8x512xf32> to vector<8x128xf32>
    %239 = arith.addf %237, %238 : vector<8x128xf32>
    %240 = arith.negf %239 : vector<8x128xf32>
    %241 = math.exp %240 : vector<8x128xf32>
    %cst_48 = arith.constant 1.000000e+00 : f32
    %242 = vector.broadcast %cst_48 : f32 to vector<8x128xf32>
    %243 = arith.addf %242, %241 : vector<8x128xf32>
    %244 = arith.divf %242, %243 : vector<8x128xf32>
    %245 = vector.extract_strided_slice %7 {offsets = [48, 256], sizes = [8, 128], strides = [1, 1]} : vector<64x512xf32> to vector<8x128xf32>
    %246 = vector.extract_strided_slice %228 {offsets = [0, 256], sizes = [8, 128], strides = [1, 1]} : vector<8x512xf32> to vector<8x128xf32>
    %247 = arith.addf %245, %246 : vector<8x128xf32>
    %248 = math.tanh %247 : vector<8x128xf32>
    %249 = vector.extract_strided_slice %7 {offsets = [48, 384], sizes = [8, 128], strides = [1, 1]} : vector<64x512xf32> to vector<8x128xf32>
    %250 = vector.extract_strided_slice %228 {offsets = [0, 384], sizes = [8, 128], strides = [1, 1]} : vector<8x512xf32> to vector<8x128xf32>
    %251 = arith.addf %249, %250 : vector<8x128xf32>
    %252 = arith.negf %251 : vector<8x128xf32>
    %253 = math.exp %252 : vector<8x128xf32>
    %cst_49 = arith.constant 1.000000e+00 : f32
    %254 = vector.broadcast %cst_49 : f32 to vector<8x128xf32>
    %255 = arith.addf %254, %253 : vector<8x128xf32>
    %256 = arith.divf %254, %255 : vector<8x128xf32>
    %257 = arith.mulf %244, %223 : vector<8x128xf32>
    %258 = arith.mulf %236, %248 : vector<8x128xf32>
    %259 = arith.addf %257, %258 : vector<8x128xf32>
    %260 = math.tanh %259 : vector<8x128xf32>
    %261 = arith.mulf %256, %260 : vector<8x128xf32>
    %262 = arith.truncf %261 : vector<8x128xf32> to vector<8x128xbf16>
    %c0_50 = arith.constant 0 : index
    %c0_51 = arith.constant 0 : index
    %263 = vector.load %arg6[%c0_50, %c0_51] : memref<128x512xbf16, #tpu.memory_space<vmem>>, vector<128x512xbf16>
    %cst_52 = arith.constant dense<0.000000e+00> : vector<8x512xf32>
    %264 = tpu.matmul %262, %263, %cst_52 {dimension_numbers = #tpu.dot_dimension_numbers<[1], [0], [0], [1], [0, 0, 1, 1], [], []>} : vector<8x128xbf16>, vector<128x512xbf16>, vector<8x512xf32> -> vector<8x512xf32>
    %265 = vector.extract_strided_slice %7 {offsets = [56, 0], sizes = [8, 128], strides = [1, 1]} : vector<64x512xf32> to vector<8x128xf32>
    %266 = vector.extract_strided_slice %264 {offsets = [0, 0], sizes = [8, 128], strides = [1, 1]} : vector<8x512xf32> to vector<8x128xf32>
    %267 = arith.addf %265, %266 : vector<8x128xf32>
    %268 = arith.negf %267 : vector<8x128xf32>
    %269 = math.exp %268 : vector<8x128xf32>
    %cst_53 = arith.constant 1.000000e+00 : f32
    %270 = vector.broadcast %cst_53 : f32 to vector<8x128xf32>
    %271 = arith.addf %270, %269 : vector<8x128xf32>
    %272 = arith.divf %270, %271 : vector<8x128xf32>
    %273 = vector.extract_strided_slice %7 {offsets = [56, 128], sizes = [8, 128], strides = [1, 1]} : vector<64x512xf32> to vector<8x128xf32>
    %274 = vector.extract_strided_slice %264 {offsets = [0, 128], sizes = [8, 128], strides = [1, 1]} : vector<8x512xf32> to vector<8x128xf32>
    %275 = arith.addf %273, %274 : vector<8x128xf32>
    %276 = arith.negf %275 : vector<8x128xf32>
    %277 = math.exp %276 : vector<8x128xf32>
    %cst_54 = arith.constant 1.000000e+00 : f32
    %278 = vector.broadcast %cst_54 : f32 to vector<8x128xf32>
    %279 = arith.addf %278, %277 : vector<8x128xf32>
    %280 = arith.divf %278, %279 : vector<8x128xf32>
    %281 = vector.extract_strided_slice %7 {offsets = [56, 256], sizes = [8, 128], strides = [1, 1]} : vector<64x512xf32> to vector<8x128xf32>
    %282 = vector.extract_strided_slice %264 {offsets = [0, 256], sizes = [8, 128], strides = [1, 1]} : vector<8x512xf32> to vector<8x128xf32>
    %283 = arith.addf %281, %282 : vector<8x128xf32>
    %284 = math.tanh %283 : vector<8x128xf32>
    %285 = vector.extract_strided_slice %7 {offsets = [56, 384], sizes = [8, 128], strides = [1, 1]} : vector<64x512xf32> to vector<8x128xf32>
    %286 = vector.extract_strided_slice %264 {offsets = [0, 384], sizes = [8, 128], strides = [1, 1]} : vector<8x512xf32> to vector<8x128xf32>
    %287 = arith.addf %285, %286 : vector<8x128xf32>
    %288 = arith.negf %287 : vector<8x128xf32>
    %289 = math.exp %288 : vector<8x128xf32>
    %cst_55 = arith.constant 1.000000e+00 : f32
    %290 = vector.broadcast %cst_55 : f32 to vector<8x128xf32>
    %291 = arith.addf %290, %289 : vector<8x128xf32>
    %292 = arith.divf %290, %291 : vector<8x128xf32>
    %293 = arith.mulf %280, %259 : vector<8x128xf32>
    %294 = arith.mulf %272, %284 : vector<8x128xf32>
    %295 = arith.addf %293, %294 : vector<8x128xf32>
    %296 = math.tanh %295 : vector<8x128xf32>
    %297 = arith.mulf %292, %296 : vector<8x128xf32>
    %298 = vector.extract_strided_slice %2 {offsets = [56, 0], sizes = [8, 63], strides = [1, 1]} : vector<64x63xbf16> to vector<8x63xbf16>
    %c0_56 = arith.constant 0 : index
    %c0_57 = arith.constant 0 : index
    %299 = vector.load %arg3[%c0_56, %c0_57] : memref<63x512xbf16, #tpu.memory_space<vmem>>, vector<63x512xbf16>
    %cst_58 = arith.constant dense<0.000000e+00> : vector<8x512xf32>
    %300 = tpu.matmul %298, %299, %cst_58 {dimension_numbers = #tpu.dot_dimension_numbers<[1], [0], [0], [1], [0, 0, 1, 1], [], []>} : vector<8x63xbf16>, vector<63x512xbf16>, vector<8x512xf32> -> vector<8x512xf32>
    %c0_59 = arith.constant 0 : index
    %c0_60 = arith.constant 0 : index
    %301 = vector.load %arg5[%c0_59, %c0_60] : memref<1x512xf32, #tpu.memory_space<vmem>>, vector<1x512xf32>
    %302 = vector.broadcast %301 : vector<1x512xf32> to vector<8x512xf32>
    %303 = arith.addf %300, %302 : vector<8x512xf32>
    %304 = vector.extract_strided_slice %303 {offsets = [0, 0], sizes = [8, 128], strides = [1, 1]} : vector<8x512xf32> to vector<8x128xf32>
    %305 = arith.negf %304 : vector<8x128xf32>
    %306 = math.exp %305 : vector<8x128xf32>
    %cst_61 = arith.constant 1.000000e+00 : f32
    %307 = vector.broadcast %cst_61 : f32 to vector<8x128xf32>
    %308 = arith.addf %307, %306 : vector<8x128xf32>
    %309 = arith.divf %307, %308 : vector<8x128xf32>
    %310 = vector.extract_strided_slice %303 {offsets = [0, 256], sizes = [8, 128], strides = [1, 1]} : vector<8x512xf32> to vector<8x128xf32>
    %311 = math.tanh %310 : vector<8x128xf32>
    %312 = vector.extract_strided_slice %303 {offsets = [0, 384], sizes = [8, 128], strides = [1, 1]} : vector<8x512xf32> to vector<8x128xf32>
    %313 = arith.negf %312 : vector<8x128xf32>
    %314 = math.exp %313 : vector<8x128xf32>
    %cst_62 = arith.constant 1.000000e+00 : f32
    %315 = vector.broadcast %cst_62 : f32 to vector<8x128xf32>
    %316 = arith.addf %315, %314 : vector<8x128xf32>
    %317 = arith.divf %315, %316 : vector<8x128xf32>
    %318 = arith.mulf %309, %311 : vector<8x128xf32>
    %319 = math.tanh %318 : vector<8x128xf32>
    %320 = arith.mulf %317, %319 : vector<8x128xf32>
    %321 = arith.truncf %297 : vector<8x128xf32> to vector<8x128xbf16>
    %c0_63 = arith.constant 0 : index
    %c0_64 = arith.constant 0 : index
    %322 = vector.load %arg7[%c0_63, %c0_64] : memref<128x128xbf16, #tpu.memory_space<vmem>>, vector<128x128xbf16>
    %cst_65 = arith.constant dense<0.000000e+00> : vector<8x128xf32>
    %323 = tpu.matmul %321, %322, %cst_65 {dimension_numbers = #tpu.dot_dimension_numbers<[1], [0], [0], [1], [0, 0, 1, 1], [], []>} : vector<8x128xbf16>, vector<128x128xbf16>, vector<8x128xf32> -> vector<8x128xf32>
    %324 = arith.truncf %320 : vector<8x128xf32> to vector<8x128xbf16>
    %c0_66 = arith.constant 0 : index
    %c0_67 = arith.constant 0 : index
    %325 = vector.load %arg8[%c0_66, %c0_67] : memref<128x128xbf16, #tpu.memory_space<vmem>>, vector<128x128xbf16>
    %cst_68 = arith.constant dense<0.000000e+00> : vector<8x128xf32>
    %326 = tpu.matmul %324, %325, %cst_68 {dimension_numbers = #tpu.dot_dimension_numbers<[1], [0], [0], [1], [0, 0, 1, 1], [], []>} : vector<8x128xbf16>, vector<128x128xbf16>, vector<8x128xf32> -> vector<8x128xf32>
    %327 = arith.addf %323, %326 : vector<8x128xf32>
    %c0_69 = arith.constant 0 : index
    %c0_70 = arith.constant 0 : index
    %328 = vector.load %arg9[%c0_69, %c0_70] : memref<1x128xf32, #tpu.memory_space<vmem>>, vector<1x128xf32>
    %329 = vector.broadcast %328 : vector<1x128xf32> to vector<8x128xf32>
    %330 = arith.addf %327, %329 : vector<8x128xf32>
    %c0_71 = arith.constant 0 : index
    %c0_72 = arith.constant 0 : index
    %331 = vector.load %arg10[%c0_71, %c0_72] : memref<8x128xf32, #tpu.memory_space<vmem>>, vector<8x128xf32>
    tpu.vector_store %arg10[%c0_71, %c0_72], %330 {strides = array<i32>} : memref<8x128xf32, #tpu.memory_space<vmem>>, vector<8x128xf32>,
    return
  }
  func.func @transform_0(%arg0: i32) -> (i32, i32, i32) {
    %c0_i32 = arith.constant 0 : i32
    %c0_i32_0 = arith.constant 0 : i32
    %c0_i32_1 = arith.constant 0 : i32
    return %c0_i32, %arg0, %c0_i32_0 : i32, i32, i32
  }
  func.func @transform_1(%arg0: i32) -> (i32, i32) {
    %c0_i32 = arith.constant 0 : i32
    %c0_i32_0 = arith.constant 0 : i32
    %c0_i32_1 = arith.constant 0 : i32
    return %c0_i32, %c0_i32_0 : i32, i32
  }
  func.func @transform_2(%arg0: i32) -> (i32, i32) {
    %c0_i32 = arith.constant 0 : i32
    %c0_i32_0 = arith.constant 0 : i32
    %c0_i32_1 = arith.constant 0 : i32
    return %c0_i32, %c0_i32_0 : i32, i32
  }
  func.func @transform_3(%arg0: i32) -> (i32, i32) {
    %c0_i32 = arith.constant 0 : i32
    %c0_i32_0 = arith.constant 0 : i32
    %c0_i32_1 = arith.constant 0 : i32
    return %c0_i32, %c0_i32_0 : i32, i32
  }
  func.func @transform_4(%arg0: i32) -> (i32, i32) {
    %c0_i32 = arith.constant 0 : i32
    %c0_i32_0 = arith.constant 0 : i32
    %c0_i32_1 = arith.constant 0 : i32
    return %c0_i32, %c0_i32_0 : i32, i32
  }
  func.func @transform_5(%arg0: i32) -> (i32, i32) {
    %c0_i32 = arith.constant 0 : i32
    %c0_i32_0 = arith.constant 0 : i32
    %c0_i32_1 = arith.constant 0 : i32
    return %c0_i32, %c0_i32_0 : i32, i32
  }
  func.func @transform_6(%arg0: i32) -> (i32, i32) {
    %c0_i32 = arith.constant 0 : i32
    %c0_i32_0 = arith.constant 0 : i32
    %c0_i32_1 = arith.constant 0 : i32
    return %c0_i32, %c0_i32_0 : i32, i32
  }
  func.func @transform_7(%arg0: i32) -> (i32, i32) {
    %c0_i32 = arith.constant 0 : i32
    %c0_i32_0 = arith.constant 0 : i32
    %c0_i32_1 = arith.constant 0 : i32
    return %c0_i32, %c0_i32_0 : i32, i32
  }
  func.func @transform_8(%arg0: i32) -> (i32, i32) {
    %c0_i32 = arith.constant 0 : i32
    %c0_i32_0 = arith.constant 0 : i32
    %c0_i32_1 = arith.constant 0 : i32
    return %c0_i32, %c0_i32_0 : i32, i32
  }
  func.func @transform_9(%arg0: i32) -> (i32, i32) {
    %c0_i32 = arith.constant 0 : i32
    %c0_i32_0 = arith.constant 0 : i32
    return %arg0, %c0_i32 : i32, i32
  }
}

</mosaic_0001>

<bundles_post_ra>
// kernel: tpu_custom_call.1
= control target key start
LH: loop header
LB: loop body
LE: loop exit
PB: predicated region body
PF: predicated region fallthrough
CT: control target
= control target key end

     0   :  { %14 = vsyncpa [#allocation3], 0  ;;  %s3358_s0 = inlined_call_operand.hbm [shape: f32[8,8,63], index: 0, kind: input, shape index: {}]   ;;  %s3359_s1 = inlined_call_operand.hbm [shape: bf16[63,512], index: 1, kind: input, shape index: {}]   ;;  %s3360_s2 = inlined_call_operand.hbm [shape: bf16[63,512], index: 2, kind: input, shape index: {}]   ;;  %s3361_s3 = inlined_call_operand.vmem [shape: f32[1,512], index: 3, kind: input, shape index: {}]   ;;  %s3362_s4 = inlined_call_operand.vmem [shape: f32[1,512], index: 4, kind: input, shape index: {}]   ;;  %s3363_s5 = inlined_call_operand.hbm [shape: bf16[128,512], index: 5, kind: input, shape index: {}]   ;;  %s3364_s6 = inlined_call_operand.hbm [shape: bf16[128,128], index: 6, kind: input, shape index: {}]   ;;  %s3365_s7 = inlined_call_operand.hbm [shape: bf16[128,128], index: 7, kind: input, shape index: {}]   ;;  %s3366_s8 = inlined_call_operand.vmem [shape: f32[1,128], index: 8, kind: input, shape index: {}]   ;;  %s3367_s9 = inlined_call_operand.hbm [shape: f32[8,128], index: 9, kind: output, shape index: {}]  }
   0x1   :  { %15 = vsyncpa [#allocation6], 0 }
   0x2   :  { %16 = vsyncpa [#allocation9], 0 }
   0x3   :  { %17 = vsyncpa [#allocation12], 0 }
   0x4   :  { %18 = vsyncpa [#allocation4], 0  ;;  %s2596_s30 = smov [#allocation5]   ;;  %s2432_s13 = scalar_lea.hbm %s3359_s1, 2048 }
   0x5   :  { %s36_s10 = sshll.u32 %s2596_s30, 4  ;;  %p2433_p0 = scmp.ne.s32.totalorder %s3359_s1, %s2432_s13  ;;  %s37_s10 = int_to_ptr.vmem [resolvable:$true] %s36_s10 }
   0x6   :  { %p2436_p1 = scmp.lt.u32.totalorder %s2432_s13, %s3359_s1 }
   0x8   :  { %p2438_p2 = pnand %p2436_p1, %p2433_p0 }
   0xa   :  { %2441 = shalt.err (!%p2438_p2)
}
   0xb   :  { %s2442_s18 = scalar_lea.vmem %s37_s10, 2048  ;;  %p2447_p4 = scmp.lt.s32.totalorder %s37_s10, %s37_s10 }
   0xc   :  { %p2443_p3 = scmp.ne.s32.totalorder %s37_s10, %s2442_s18  ;;  %p2448_p5 = scmp.lt.s32.totalorder %s2442_s18, %s2442_s18 }
   0xe   :  { %p2449_p6 = por %p2448_p5, %p2447_p4 }
  0x10   :  { %p2450_p7 = pnand %p2449_p6, %p2443_p3 }
  0x12   :  { %2453 = shalt.err (!%p2450_p7)
}
  0x13   :  { %s2597_s19 = smov 256   ;;  %s2598_s20 = smov 16  }
  0x14   :  { %42 = dma.hbm_to_vmem [thread:$0]  %s3359_s1, 2048, %s37_s10, [#allocation6], %s2597_s19, %s2597_s19, %s2598_s20  }
  0x15   :  { %s2599_s23 = smov [#allocation8]   ;;  %s2600_s25 = smov [#allocation2]  }
  0x16   :  { %s64_s24 = sshll.u32 %s2599_s23, 4  ;;  %s24_s26 = sshll.u32 %s2600_s25, 4  ;;  %s65_s24 = int_to_ptr.vmem [resolvable:$true] %s64_s24  ;;  %s25_s26 = int_to_ptr.vmem [resolvable:$true] %s24_s26 }
  0x17   :  { %s2454_s29 = scalar_lea.hbm %s3363_s5, 4096 }
  0x18   :  { %p2455_p8 = scmp.ne.s32.totalorder %s3363_s5, %s2454_s29  ;;  %p2458_p9 = scmp.lt.u32.totalorder %s2454_s29, %s3363_s5 }
  0x1a   :  { %p2460_p10 = pnand %p2458_p9, %p2455_p8 }
  0x1c   :  { %2463 = shalt.err (!%p2460_p10)
}
  0x1d   :  { %s2464_s1 = scalar_lea.vmem %s65_s24, 4096  ;;  %p2469_p12 = scmp.lt.s32.totalorder %s65_s24, %s65_s24 }
  0x1e   :  { %p2465_p11 = scmp.ne.s32.totalorder %s65_s24, %s2464_s1  ;;  %p2470_p13 = scmp.lt.s32.totalorder %s2464_s1, %s2464_s1 }
  0x20   :  { %p2471_p0 = por %p2470_p13, %p2469_p12 }
  0x22   :  { %p2472_p1 = pnand %p2471_p0, %p2465_p11 }
  0x24   :  { %2475 = shalt.err (!%p2472_p1)
}
  0x25   :  { %70 = dma.hbm_to_vmem [thread:$0]  %s3363_s5, 4096, %s65_s24, [#allocation9], %s2597_s19, %s2597_s19, %s2598_s20  }
  0x26   :  { %s2476_s17 = scalar_lea.hbm %s3358_s0, 1024 }
  0x27   :  { %p2477_p2 = scmp.ne.s32.totalorder %s3358_s0, %s2476_s17  ;;  %p2480_p3 = scmp.lt.u32.totalorder %s2476_s17, %s3358_s0 }
  0x29   :  { %p2482_p4 = pnand %p2480_p3, %p2477_p2 }
  0x2b   :  { %2485 = shalt.err (!%p2482_p4)
}
  0x2c   :  { %s2486_s25 = scalar_lea.vmem %s25_s26, 1024  ;;  %p2491_p6 = scmp.lt.s32.totalorder %s25_s26, %s25_s26 }
  0x2d   :  { %p2487_p5 = scmp.ne.s32.totalorder %s25_s26, %s2486_s25  ;;  %p2492_p7 = scmp.lt.s32.totalorder %s2486_s25, %s2486_s25 }
  0x2f   :  { %p2493_p8 = por %p2492_p7, %p2491_p6 }
  0x31   :  { %p2494_p9 = pnand %p2493_p8, %p2487_p5 }
  0x33   :  { %2497 = shalt.err (!%p2494_p9)
}
  0x34   :  { %s2601_s5 = smov 128   ;;  %s2602_s24 = smov 8  }
  0x35   :  { %30 = dma.hbm_to_vmem [thread:$0]  %s3358_s0, 1024, %s25_s26, [#allocation3], %s2601_s5, %s2601_s5, %s2602_s24  }
  0x36   :  { %s2603_s29 = smov [#allocation7]   ;;  %s2604_s11 = smov [#allocation10]  }
  0x37   :  { %s48_s30 = sshll.u32 %s2603_s29, 4  ;;  %s76_s12 = sshll.u32 %s2604_s11, 4  ;;  %s49_s30 = int_to_ptr.vmem [resolvable:$true] %s48_s30  ;;  %s77_s12 = int_to_ptr.vmem [resolvable:$true] %s76_s12 }
  0x38   :  { %s2498_s10 = scalar_lea.hbm %s3360_s2, 2048 }
  0x39   :  { %p2499_p10 = scmp.ne.s32.totalorder %s3360_s2, %s2498_s10  ;;  %p2502_p11 = scmp.lt.u32.totalorder %s2498_s10, %s3360_s2 }
  0x3b   :  { %p2504_p12 = pnand %p2502_p11, %p2499_p10 }
  0x3d   :  { %2507 = shalt.err (!%p2504_p12)
}
  0x3e   :  { %s2508_s0 = scalar_lea.vmem %s49_s30, 2048  ;;  %p2513_p0 = scmp.lt.s32.totalorder %s49_s30, %s49_s30 }
  0x3f   :  { %p2509_p13 = scmp.ne.s32.totalorder %s49_s30, %s2508_s0  ;;  %p2514_p1 = scmp.lt.s32.totalorder %s2508_s0, %s2508_s0 }
  0x41   :  { %p2515_p2 = por %p2514_p1, %p2513_p0 }
  0x43   :  { %p2516_p3 = pnand %p2515_p2, %p2509_p13 }
  0x45   :  { %2519 = shalt.err (!%p2516_p3)
}
  0x46   :  { %54 = dma.hbm_to_vmem [thread:$0]  %s3360_s2, 2048, %s49_s30, [#allocation6], %s2597_s19, %s2597_s19, %s2598_s20  }
  0x47   :  { %s2520_s23 = scalar_lea.hbm %s3364_s6, 1024 }
  0x48   :  { %p2521_p4 = scmp.ne.s32.totalorder %s3364_s6, %s2520_s23  ;;  %p2524_p5 = scmp.lt.u32.totalorder %s2520_s23, %s3364_s6 }
  0x4a   :  { %p2526_p6 = pnand %p2524_p5, %p2521_p4 }
  0x4c   :  { %2529 = shalt.err (!%p2526_p6)
}
  0x4d   :  { %s2530_s28 = scalar_lea.vmem %s77_s12, 1024  ;;  %p2535_p8 = scmp.lt.s32.totalorder %s77_s12, %s77_s12 }
  0x4e   :  { %p2531_p7 = scmp.ne.s32.totalorder %s77_s12, %s2530_s28  ;;  %p2536_p9 = scmp.lt.s32.totalorder %s2530_s28, %s2530_s28 }
  0x50   :  { %p2537_p10 = por %p2536_p9, %p2535_p8 }
  0x52   :  { %p2538_p11 = pnand %p2537_p10, %p2531_p7 }
  0x54   :  { %2541 = shalt.err (!%p2538_p11)
}
  0x55   :  { %s2605_s2 = smov 64   ;;  %s2606_s19 = smov 4  }
  0x56   :  { %82 = dma.hbm_to_vmem [thread:$0]  %s3364_s6, 1024, %s77_s12, [#allocation9], %s2605_s2, %s2605_s2, %s2606_s19  }
  0x57   :  { %s2607_s30 = smov [#allocation11]   ;;  %s2542_s10 = scalar_lea.hbm %s3365_s7, 1024 }
  0x58   :  { %s88_s11 = sshll.u32 %s2607_s30, 4  ;;  %p2543_p12 = scmp.ne.s32.totalorder %s3365_s7, %s2542_s10  ;;  %s89_s11 = int_to_ptr.vmem [resolvable:$true] %s88_s11 }
  0x59   :  { %p2546_p13 = scmp.lt.u32.totalorder %s2542_s10, %s3365_s7 }
  0x5b   :  { %p2548_p0 = pnand %p2546_p13, %p2543_p12 }
  0x5d   :  { %2551 = shalt.err (!%p2548_p0)
}
  0x5e   :  { %s2552_s0 = scalar_lea.vmem %s89_s11, 1024  ;;  %p2557_p2 = scmp.lt.s32.totalorder %s89_s11, %s89_s11 }
  0x5f   :  { %p2553_p1 = scmp.ne.s32.totalorder %s89_s11, %s2552_s0  ;;  %p2558_p3 = scmp.lt.s32.totalorder %s2552_s0, %s2552_s0 }
  0x61   :  { %p2559_p4 = por %p2558_p3, %p2557_p2 }
  0x63   :  { %p2560_p5 = pnand %p2559_p4, %p2553_p1 }
  0x65   :  { %2563 = shalt.err (!%p2560_p5)
}
  0x66   :  { %94 = dma.hbm_to_vmem [thread:$0]  %s3365_s7, 1024, %s89_s11, [#allocation12], %s2605_s2, %s2605_s2, %s2606_s19  }
  0x67   :  { %2586 = dma.done.wait [#allocation3], 1024  }
  0x68   :  { %2587 = vsyncadd [#allocation3], 4294966272 }
  0x69   :  { %2588 = dma.done.wait [#allocation6], 4096  }
  0x6a   :  { %2589 = vsyncadd [#allocation6], 4294963200 }
  0x6b   :  { %2590 = dma.done.wait [#allocation9], 5120  }
  0x6c   :  { %2591 = vsyncadd [#allocation9], 4294962176 }
  0x6d   :  { %2592 = dma.done.wait [#allocation12], 1024  }
  0x6e   :  { %2593 = vsyncadd [#allocation12], 4294966272  ;;  %v3371_v0 = vmov 0   ;;  %v2148_v1 = vld [vmem:[#allocation5 + $0x4] ss:$16 sps:$4 sm:$0xff]   ;;  %vm255_vm0 = vcmask 1046528  }
  0x6f   :  { %303 = vmatprep.mubr.bf16.mxu0 %v3371_v0  ;;  %376 = vmatprep.mubr.bf16.mxu1 %v3371_v0  ;;  %v2150_v2 = vld [vmem:[#allocation5 + $0xc] ss:$16 sps:$4 sm:$0xff]   ;;  %v2152_v3 = vld [vmem:[#allocation5] ss:$16 sps:$4 sm:$0xff]   ;;  %v2153_v4 = vld [vmem:[#allocation5 + $0x8] ss:$16 sps:$4 sm:$0xff]  }
  0x70   :  { %271 = vmatprep.subr.bf16.mxu0 %v2148_v1  ;;  %344 = vmatprep.subr.bf16.mxu1 %v2150_v2  ;;  %v2154_v5 = vld [vmem:[#allocation5 + $0x24] ss:$16 sps:$4 sm:$0xff]   ;;  %vm256_vm1 = vcmask 1047552   ;;  %v2609_v6 = vmov 65535   ;;  %v2156_v8 = vld [vmem:[#allocation5 + $0x2c] ss:$16 sps:$4 sm:$0xff]  }
  0x71   :  { %v257_v7 = vsel %vm255_vm0, 4294967295, %v2609_v6  ;;  %272 = vmatpush1.bf16.msra.mxu0 %v2152_v3  ;;  %345 = vmatpush1.bf16.msra.mxu1 %v2153_v4  ;;  %v2158_v9 = vld [vmem:[#allocation5 + $0x20] ss:$16 sps:$4 sm:$0xff]   ;;  %v2159_v10 = vld [vmem:[#allocation5 + $0x28] ss:$16 sps:$4 sm:$0xff]   ;;  %vm242_vm2 = vcmask 515072  }
  0x72   :  { %273 = vmatprep.subr.bf16.mxu0 %v2154_v5  ;;  %346 = vmatprep.subr.bf16.mxu1 %v2156_v8  ;;  %v2160_v11 = vld [vmem:[#allocation5 + $0x44] ss:$16 sps:$4 sm:$0xff]   ;;  %v2746_v12 = vsel %vm256_vm1, %v257_v7, 0  ;;  %v2162_v13 = vld [vmem:[#allocation5 + $0x4c] ss:$16 sps:$4 sm:$0xff]   ;;  %v146_v5 = vlaneseq  ;;  %vm2611_vm3 = vmmov 0  }
  0x73   :  { %3378 = vst [vmem:[#allocation19_spill] sm:$0xff] %v2746_v12  ;;  %v2164_v14 = vld [vmem:[#allocation5 + $0x40] ss:$16 sps:$4 sm:$0xff]   ;;  %v2165_v15 = vld [vmem:[#allocation5 + $0x48] ss:$16 sps:$4 sm:$0xff]   ;;  %s2612_s22 = smov [#allocation13]  }
  0x74   :  { %v2166_v16 = vld [vmem:[#allocation5 + $0x64] ss:$16 sps:$4 sm:$0xff]   ;;  %v2168_v17 = vld [vmem:[#allocation5 + $0x6c] ss:$16 sps:$4 sm:$0xff]   ;;  %v2170_v19 = vld [vmem:[#allocation5 + $0x60] ss:$16 sps:$4 sm:$0xff]  }
  0x75   :  { %274 = vmatpush1.bf16.msra.mxu0 %v2158_v9  ;;  %347 = vmatpush1.bf16.msra.mxu1 %v2159_v10  ;;  %v263_v18 = vand.u32 %v2166_v16, %v2746_v12  ;;  %v2171_v20 = vld [vmem:[#allocation5 + $0x68] ss:$16 sps:$4 sm:$0xff]   ;;  %v269_v21 = vand.u32 %v2168_v17, %v2746_v12  ;;  %v116_v22 = vld [vmem:[#allocation2] sm:$0xff]  ;;  %v260_v23 = vand.u32 %v2170_v19, %v2746_v12  ;;  %v2754_v27 = vld [vmem:[#allocation8 + $0xc] ss:$16 sps:$4 sm:$0xff]   ;;  %v2906_v6 = vshrl.u32 %v146_v5, 7 }
  0x76   :  { %275 = vmatprep.subr.bf16.mxu0 %v2160_v11  ;;  %348 = vmatprep.subr.bf16.mxu1 %v2162_v13  ;;  %v266_v24 = vand.u32 %v2171_v20, %v2746_v12  ;;  %v117_v25 = vld [vmem:[#allocation2 + $0x8] sm:$0xff]  ;;  %v2752_v26 = vld [vmem:[#allocation8 + $0x4] ss:$16 sps:$4 sm:$0xff]   ;;  %v2756_v29 = vld [vmem:[#allocation8] ss:$16 sps:$4 sm:$0xff]   ;;  %s1944_s23 = sshll.u32 %s2612_s22, 4  ;;  %s1945_s23 = int_to_ptr.vmem [resolvable:$true] %s1944_s23 }
  0x77   :  { %v124_v28 = vpack.c.bf16 %v117_v25, %v116_v22  ;;  %v2758_v30 = vld [vmem:[#allocation8 + $0x8] ss:$16 sps:$4 sm:$0xff]   ;;  %v2760_v31 = vld [vmem:[#allocation8 + $0x24] ss:$16 sps:$4 sm:$0xff]   ;;  %v2764_v32 = vld [vmem:[#allocation8 + $0x2c] ss:$16 sps:$4 sm:$0xff]   ;;  %p2569_p7 = scmp.lt.s32.totalorder %s1945_s23, %s1945_s23 }
  0x78   :  { %v2766_v33 = vld [vmem:[#allocation8 + $0x20] ss:$16 sps:$4 sm:$0xff]   ;;  %v2770_v34 = vld [vmem:[#allocation8 + $0x28] ss:$16 sps:$4 sm:$0xff]   ;;  %v2774_v37 = vld [vmem:[#allocation8 + $0x44] ss:$16 sps:$4 sm:$0xff]  }
  0x79   :  { %276 = vmatpush1.bf16.msra.mxu0 %v2164_v14  ;;  %349 = vmatpush1.bf16.msra.mxu1 %v2165_v15  ;;  %v118_v35 = vld [vmem:[#allocation2 + $0x10] sm:$0xff]  ;;  %v119_v36 = vld [vmem:[#allocation2 + $0x18] sm:$0xff]  ;;  %v120_v46 = vld [vmem:[#allocation2 + $0x20] sm:$0xff]  ;;  %3380 = vst [vmem:[#allocation21_spill] sm:$0xff] %v2906_v6  ;;  %v3368_v7 = vsub.s32 2, %v2906_v6  ;;  %v3369_v8 = vsub.s32 3, %v2906_v6 }
  0x7a   :  { %277 = vmatprep.subr.bf16.mxu0 %v263_v18  ;;  %350 = vmatprep.subr.bf16.mxu1 %v269_v21  ;;  %v2778_v38 = vld [vmem:[#allocation8 + $0x4c] ss:$16 sps:$4 sm:$0xff]   ;;  %v125_v39 = vpack.c.bf16 %v119_v36, %v118_v35  ;;  %v2782_v40 = vld [vmem:[#allocation8 + $0x40] ss:$16 sps:$4 sm:$0xff]   ;;  %v2786_v41 = vld [vmem:[#allocation8 + $0x48] ss:$16 sps:$4 sm:$0xff]  }
  0x7b   :  { %v2790_v42 = vld [vmem:[#allocation8 + $0x64] ss:$16 sps:$4 sm:$0xff]   ;;  %v2792_v43 = vld [vmem:[#allocation8 + $0x6c] ss:$16 sps:$4 sm:$0xff]   ;;  %v2794_v44 = vld [vmem:[#allocation8 + $0x60] ss:$16 sps:$4 sm:$0xff]  }
  0x7c   :  { %v2798_v45 = vld [vmem:[#allocation8 + $0x68] ss:$16 sps:$4 sm:$0xff]   ;;  %v2802_v48 = vld [vmem:[#allocation8 + $0x84] ss:$16 sps:$4 sm:$0xff]   ;;  %v2806_v49 = vld [vmem:[#allocation8 + $0x8c] ss:$16 sps:$4 sm:$0xff]  }
  0x7d   :  { %278 = vmatpush1.bf16.msra.mxu0 %v260_v23  ;;  %351 = vmatpush1.bf16.msra.mxu1 %v266_v24  ;;  %v121_v47 = vld [vmem:[#allocation2 + $0x28] sm:$0xff]  ;;  %v2810_v51 = vld [vmem:[#allocation8 + $0x80] ss:$16 sps:$4 sm:$0xff]   ;;  %v2816_v53 = vld [vmem:[#allocation8 + $0xa4] ss:$16 sps:$4 sm:$0xff]   ;;  %v3370_v9 = vsub.s32 0, %v2906_v6 }
  0x7e   :  { %609 = vmatprep.subr.bf16.mxu0 %v2752_v26  ;;  %650 = vmatprep.subr.bf16.mxu1 %v2754_v27  ;;  %v126_v50 = vpack.c.bf16 %v121_v47, %v120_v46  ;;  %v2812_v52 = vld [vmem:[#allocation8 + $0x88] ss:$16 sps:$4 sm:$0xff]   ;;  %v2820_v54 = vld [vmem:[#allocation8 + $0xac] ss:$16 sps:$4 sm:$0xff]   ;;  %v2822_v55 = vld [vmem:[#allocation8 + $0xa0] ss:$16 sps:$4 sm:$0xff]  }
  0x7f   :  { %v2824_v56 = vld [vmem:[#allocation8 + $0xa8] ss:$16 sps:$4 sm:$0xff]   ;;  %v122_v57 = vld [vmem:[#allocation2 + $0x30] sm:$0xff]  ;;  %v2830_v60 = vld [vmem:[#allocation8 + $0xcc] ss:$16 sps:$4 sm:$0xff]   ;;  %v152_v11 = vsub.s32 1, %v2906_v6 }
  0x80   :  { %1972 = vmatmul.mubr.msk.bf16.vlgmr.msra.gmra.mrb[0].mxu0 %vm242_vm2, %v124_v28  ;;  %1976 = vmatmul.mubr.msk.bf16.vlgmr.msra.gmra.mrb[0].mxu1 %vm242_vm2, %v124_v28  ;;  %v123_v58 = vld [vmem:[#allocation2 + $0x38] sm:$0xff]  ;;  %v2828_v59 = vld [vmem:[#allocation8 + $0xc4] ss:$16 sps:$4 sm:$0xff]   ;;  %v2838_v61 = vld [vmem:[#allocation8 + $0xc0] ss:$16 sps:$4 sm:$0xff]   ;;  %s2564_s25 = scalar_lea.vmem %s1945_s23, 128 }
  0x81   :  { %610 = vmatpush1.bf16.msra.mxu0 %v2756_v29  ;;  %651 = vmatpush1.bf16.msra.mxu1 %v2758_v30  ;;  %v2840_v62 = vld [vmem:[#allocation8 + $0xc8] ss:$16 sps:$4 sm:$0xff]   ;;  %v2842_v63 = vpack.c.bf16 %v123_v58, %v122_v57  ;;  %v2844_v1 = vld [vmem:[#allocation8 + $0xe4] ss:$16 sps:$4 sm:$0xff]   ;;  %v2846_v2 = vld [vmem:[#allocation8 + $0xec] ss:$16 sps:$4 sm:$0xff]   ;;  %p2565_p6 = scmp.ne.s32.totalorder %s1945_s23, %s2564_s25  ;;  %p2570_p8 = scmp.lt.s32.totalorder %s2564_s25, %s2564_s25 }
  0x82   :  { %611 = vmatprep.subr.bf16.mxu0 %v2760_v31  ;;  %652 = vmatprep.subr.bf16.mxu1 %v2764_v32  ;;  %v2852_v3 = vld [vmem:[#allocation8 + $0xe0] ss:$16 sps:$4 sm:$0xff]   ;;  %v2854_v4 = vld [vmem:[#allocation8 + $0xe8] ss:$16 sps:$4 sm:$0xff]  }
  0x83   :  { %313 = vmatprep.mubr.bf16.mxu0 %v3371_v0  ;;  %386 = vmatprep.mubr.bf16.mxu1 %v3371_v0  ;;  %3379 = vst [vmem:[#allocation20_spill] sm:$0xff] %v2842_v63  ;;  %v144_v10 = vld [vmem:[%s3361_s3] sm:$0xf]  ;;  %p2571_p9 = por %p2570_p8, %p2569_p7 }
  0x84   :  { %v2917_v13 = vrot.slane %v144_v10, %v3368_v7  ;;  %v2925_v16 = vrot.slane %v144_v10, %v3369_v8  ;;  %v149_v17 = vrot.slane %v144_v10, %v3370_v9  ;;  %v153_v20 = vrot.slane %v144_v10, %v152_v11 }
  0x85   :  { %612 = vmatpush1.bf16.msra.mxu0 %v2766_v33  ;;  %653 = vmatpush1.bf16.msra.mxu1 %v2770_v34  ;;  %p2572_p10 = pnand %p2571_p9, %p2565_p6 }
  0x86   :  { %613 = vmatprep.subr.bf16.mxu0 %v2774_v37  ;;  %654 = vmatprep.subr.bf16.mxu1 %v2778_v38 }
  0x88   :  { %1973 = vmatmul.mubr.msk.bf16.gmra.mrb[4].mxu0 %vm242_vm2, %v125_v39  ;;  %1977 = vmatmul.mubr.msk.bf16.gmra.mrb[4].mxu1 %vm242_vm2, %v125_v39 }
  0x89   :  { %614 = vmatpush1.bf16.msra.mxu0 %v2782_v40  ;;  %655 = vmatpush1.bf16.msra.mxu1 %v2786_v41 }
  0x8a   :  { %615 = vmatprep.subr.bf16.mxu0 %v2790_v42  ;;  %656 = vmatprep.subr.bf16.mxu1 %v2792_v43 }
  0x8b   :  { %323 = vmatprep.mubr.bf16.mxu0 %v3371_v0  ;;  %396 = vmatprep.mubr.bf16.mxu1 %v3371_v0 }
  0x8d   :  { %616 = vmatpush1.bf16.msra.mxu0 %v2794_v44  ;;  %657 = vmatpush1.bf16.msra.mxu1 %v2798_v45 }
  0x8e   :  { %617 = vmatprep.subr.bf16.mxu0 %v2802_v48  ;;  %658 = vmatprep.subr.bf16.mxu1 %v2806_v49 }
  0x90   :  { %1974 = vmatmul.mubr.msk.bf16.gmra.mrb[8].mxu0 %vm242_vm2, %v126_v50  ;;  %1978 = vmatmul.mubr.msk.bf16.gmra.mrb[8].mxu1 %vm242_vm2, %v126_v50 }
  0x91   :  { %618 = vmatpush1.bf16.msra.mxu0 %v2810_v51  ;;  %659 = vmatpush1.bf16.msra.mxu1 %v2812_v52 }
  0x92   :  { %619 = vmatprep.subr.bf16.mxu0 %v2816_v53  ;;  %660 = vmatprep.subr.bf16.mxu1 %v2820_v54 }
  0x93   :  { %333 = vmatprep.mubr.bf16.mxu0 %v3371_v0  ;;  %406 = vmatprep.mubr.bf16.mxu1 %v3371_v0 }
  0x95   :  { %620 = vmatpush1.bf16.msra.mxu0 %v2822_v55  ;;  %661 = vmatpush1.bf16.msra.mxu1 %v2824_v56 }
  0x96   :  { %621 = vmatprep.subr.bf16.mxu0 %v2828_v59  ;;  %662 = vmatprep.subr.bf16.mxu1 %v2830_v60 }
  0x98   :  { %1975 = vmatmul.mubr.msk.bf16.gmra.mrb[12].mxu0 %vm242_vm2, %v2842_v63  ;;  %1979 = vmatmul.mubr.msk.bf16.gmra.mrb[12].mxu1 %vm242_vm2, %v2842_v63 }
  0x99   :  { %622 = vmatpush1.bf16.msra.mxu0 %v2838_v61  ;;  %663 = vmatpush1.bf16.msra.mxu1 %v2840_v62 }
  0x9a   :  { %623 = vmatprep.subr.bf16.mxu0 %v2844_v1  ;;  %664 = vmatprep.subr.bf16.mxu1 %v2846_v2 }
  0x9b   :  { %641 = vmatprep.mubr.bf16.mxu0 %v3371_v0  ;;  %682 = vmatprep.mubr.bf16.mxu1 %v3371_v0 }
  0x9d   :  { %624 = vmatpush1.bf16.msra.mxu0 %v2852_v3  ;;  %665 = vmatpush1.bf16.msra.mxu1 %v2854_v4 }
  0x9e   :  { %720 = vmatprep.subr.bf16.mxu0 %v2752_v26  ;;  %761 = vmatprep.subr.bf16.mxu1 %v2754_v27 }
  0xa0   :  { %642 = vmatmul.mubr.bf16.vlgmr.msra.gmra.mrb[16].mxu0 %v3371_v0  ;;  %683 = vmatmul.mubr.bf16.vlgmr.msra.gmra.mrb[16].mxu1 %v3371_v0 }
  0xa1   :  { %721 = vmatpush1.bf16.msra.mxu0 %v2756_v29  ;;  %762 = vmatpush1.bf16.msra.mxu1 %v2758_v30 }
  0xa2   :  { %722 = vmatprep.subr.bf16.mxu0 %v2760_v31  ;;  %763 = vmatprep.subr.bf16.mxu1 %v2764_v32 }
  0xa3   :  { %752 = vmatprep.mubr.bf16.mxu0 %v3371_v0  ;;  %793 = vmatprep.mubr.bf16.mxu1 %v3371_v0 }
  0xa5   :  { %723 = vmatpush1.bf16.msra.mxu0 %v2766_v33  ;;  %764 = vmatpush1.bf16.msra.mxu1 %v2770_v34 }
  0xa6   :  { %724 = vmatprep.subr.bf16.mxu0 %v2774_v37  ;;  %765 = vmatprep.subr.bf16.mxu1 %v2778_v38 }
  0xa9   :  { %725 = vmatpush1.bf16.msra.mxu0 %v2782_v40  ;;  %766 = vmatpush1.bf16.msra.mxu1 %v2786_v41 }
  0xaa   :  { %726 = vmatprep.subr.bf16.mxu0 %v2790_v42  ;;  %767 = vmatprep.subr.bf16.mxu1 %v2792_v43 }
  0xad   :  { %727 = vmatpush1.bf16.msra.mxu0 %v2794_v44  ;;  %768 = vmatpush1.bf16.msra.mxu1 %v2798_v45 }
  0xae   :  { %728 = vmatprep.subr.bf16.mxu0 %v2802_v48  ;;  %769 = vmatprep.subr.bf16.mxu1 %v2806_v49 }
  0xb1   :  { %729 = vmatpush1.bf16.msra.mxu0 %v2810_v51  ;;  %770 = vmatpush1.bf16.msra.mxu1 %v2812_v52 }
  0xb2   :  { %730 = vmatprep.subr.bf16.mxu0 %v2816_v53  ;;  %771 = vmatprep.subr.bf16.mxu1 %v2820_v54 }
  0xb5   :  { %731 = vmatpush1.bf16.msra.mxu0 %v2822_v55  ;;  %772 = vmatpush1.bf16.msra.mxu1 %v2824_v56 }
  0xb6   :  { %732 = vmatprep.subr.bf16.mxu0 %v2828_v59  ;;  %773 = vmatprep.subr.bf16.mxu1 %v2830_v60 }
  0xb9   :  { %733 = vmatpush1.bf16.msra.mxu0 %v2838_v61  ;;  %774 = vmatpush1.bf16.msra.mxu1 %v2840_v62 }
  0xba   :  { %734 = vmatprep.subr.bf16.mxu0 %v2844_v1  ;;  %775 = vmatprep.subr.bf16.mxu1 %v2846_v2 }
  0xbd   :  { %735 = vmatpush1.bf16.msra.mxu0 %v2852_v3  ;;  %776 = vmatpush1.bf16.msra.mxu1 %v2854_v4 }
  0xbe   :  { %831 = vmatprep.subr.bf16.mxu0 %v2752_v26  ;;  %872 = vmatprep.subr.bf16.mxu1 %v2754_v27 }
 0x153   :  { %v2919_v14 = vpop.f32.mrb[0].mxu0  ;;  %v2921_v15 = vpop.f32.mrb[0].mxu1 }
 0x154   :  { %v307_v18 = vpop.f32.mrb[1].mxu0  ;;  %v380_v19 = vpop.f32.mrb[1].mxu1 }
 0x155   :  { %v309_v21 = vpop.f32.mrb[2].mxu0  ;;  %v382_v22 = vpop.f32.mrb[2].mxu1 }
 0x156   :  { %v2929_v23 = vadd.f32 %v309_v21, %v149_v17  ;;  %v311_v24 = vpop.f32.mrb[3].mxu0  ;;  %v2932_v25 = vadd.f32 %v382_v22, %v2917_v13  ;;  %v384_v28 = vpop.f32.mrb[3].mxu1 }
 0x157   :  { %v2934_v35 = vadd.f32 %v311_v24, %v153_v20  ;;  %v2937_v36 = vadd.f32 %v384_v28, %v2925_v16 }
 0x15b   :  { %v315_v39 = vpop.f32.mrb[4].mxu0  ;;  %v388_v46 = vpop.f32.mrb[4].mxu1 }
 0x15c   :  { %v2939_v47 = vadd.f32 %v315_v39, %v149_v17  ;;  %v317_v50 = vpop.f32.mrb[5].mxu0  ;;  %v2942_v57 = vadd.f32 %v388_v46, %v2917_v13  ;;  %v390_v58 = vpop.f32.mrb[5].mxu1 }
 0x15d   :  { %v2944_v5 = vadd.f32 %v317_v50, %v153_v20  ;;  %v319_v10 = vpop.f32.mrb[6].mxu0  ;;  %v2947_v11 = vadd.f32 %v390_v58, %v2925_v16  ;;  %v392_v21 = vpop.f32.mrb[6].mxu1 }
 0x15e   :  { %v2949_v22 = vadd.f32 %v319_v10, %v149_v17  ;;  %v321_v24 = vpop.f32.mrb[7].mxu0  ;;  %v2952_v28 = vadd.f32 %v392_v21, %v2917_v13  ;;  %v394_v39 = vpop.f32.mrb[7].mxu1 }
 0x15f   :  { %3381 = vst [vmem:[#allocation22_spill] sm:$0xff] %v2947_v11  ;;  %v2954_v7 = vadd.f32 %v321_v24, %v153_v20  ;;  %v2957_v46 = vadd.f32 %v394_v39, %v2925_v16 }
 0x160   :  { %3382 = vst [vmem:[#allocation23_spill] sm:$0xff] %v2949_v22  ;;  %3383 = vst [vmem:[#allocation24_spill] sm:$0xff] %v2952_v28 }
 0x161   :  { %3384 = vst [vmem:[#allocation25_spill] sm:$0xff] %v2954_v7  ;;  %3385 = vst [vmem:[#allocation26_spill] sm:$0xff] %v2957_v46 }
 0x163   :  { %v325_v8 = vpop.f32.mrb[8].mxu0  ;;  %v398_v50 = vpop.f32.mrb[8].mxu1 }
 0x164   :  { %v2959_v9 = vadd.f32 %v325_v8, %v149_v17  ;;  %v327_v0 = vpop.f32.mrb[9].mxu0  ;;  %v2962_v58 = vadd.f32 %v398_v50, %v2917_v13  ;;  %v400_v10 = vpop.f32.mrb[9].mxu1 }
 0x165   :  { %v2964_v6 = vadd.f32 %v327_v0, %v153_v20  ;;  %v329_v63 = vpop.f32.mrb[10].mxu0  ;;  %v2967_v21 = vadd.f32 %v400_v10, %v2925_v16  ;;  %v402_v24 = vpop.f32.mrb[10].mxu1 }
 0x166   :  { %3386 = vst [vmem:[#allocation27_spill] sm:$0xff] %v2959_v9  ;;  %3387 = vst [vmem:[#allocation28_spill] sm:$0xff] %v2962_v58  ;;  %v2969_v12 = vadd.f32 %v329_v63, %v149_v17  ;;  %v331_v39 = vpop.f32.mrb[11].mxu0  ;;  %v2972_v46 = vadd.f32 %v402_v24, %v2917_v13  ;;  %v404_v8 = vpop.f32.mrb[11].mxu1 }
 0x167   :  { %3388 = vst [vmem:[#allocation29_spill] sm:$0xff] %v2964_v6  ;;  %3389 = vst [vmem:[#allocation30_spill] sm:$0xff] %v2967_v21  ;;  %v2974_v9 = vadd.f32 %v331_v39, %v153_v20  ;;  %v2977_v50 = vadd.f32 %v404_v8, %v2925_v16 }
 0x168   :  { %3390 = vst [vmem:[#allocation31_spill] sm:$0xff] %v2969_v12  ;;  %3391 = vst [vmem:[#allocation32_spill] sm:$0xff] %v2972_v46 }
 0x169   :  { %3392 = vst [vmem:[#allocation33_spill] sm:$0xff] %v2974_v9  ;;  %3393 = vst [vmem:[#allocation34_spill] sm:$0xff] %v2977_v50 }
 0x16b   :  { %v335_v58 = vpop.f32.mrb[12].mxu0  ;;  %v408_v0 = vpop.f32.mrb[12].mxu1 }
 0x16c   :  { %v2979_v6 = vadd.f32 %v335_v58, %v149_v17  ;;  %v337_v7 = vpop.f32.mrb[13].mxu0  ;;  %v2982_v10 = vadd.f32 %v408_v0, %v2917_v13  ;;  %v410_v63 = vpop.f32.mrb[13].mxu1 }
 0x16d   :  { %v2984_v12 = vadd.f32 %v337_v7, %v153_v20  ;;  %v339_v21 = vpop.f32.mrb[14].mxu0  ;;  %v2987_v24 = vadd.f32 %v410_v63, %v2925_v16  ;;  %v412_v39 = vpop.f32.mrb[14].mxu1  ;;  %v306_v7 = vadd.f32 %v2919_v14, %v149_v17  ;;  %v308_v63 = vadd.f32 %v307_v18, %v153_v20 }
 0x16e   :  { %3394 = vst [vmem:[#allocation35_spill] sm:$0xff] %v2979_v6  ;;  %3395 = vst [vmem:[#allocation36_spill] sm:$0xff] %v2982_v10  ;;  %v2989_v9 = vadd.f32 %v339_v21, %v149_v17  ;;  %v341_v8 = vpop.f32.mrb[15].mxu0  ;;  %v2992_v50 = vadd.f32 %v412_v39, %v2917_v13  ;;  %v414_v58 = vpop.f32.mrb[15].mxu1 }
 0x16f   :  { %3396 = vst [vmem:[#allocation37_spill] sm:$0xff] %v2984_v12  ;;  %3397 = vst [vmem:[#allocation38_spill] sm:$0xff] %v2987_v24  ;;  %v2994_v6 = vadd.f32 %v341_v8, %v153_v20  ;;  %v2997_v0 = vadd.f32 %v414_v58, %v2925_v16  ;;  %v379_v12 = vadd.f32 %v2921_v15, %v2917_v13 }
 0x170   :  { %3398 = vst [vmem:[#allocation39_spill] sm:$0xff] %v2989_v9  ;;  %3399 = vst [vmem:[#allocation40_spill] sm:$0xff] %v2992_v50  ;;  %v381_v24 = vadd.f32 %v380_v19, %v2925_v16 }
 0x171   :  { %3400 = vst [vmem:[#allocation41_spill] sm:$0xff] %v2994_v6  ;;  %3401 = vst [vmem:[#allocation42_spill] sm:$0xff] %v2997_v0 }
 0x173   :  { %v643_v21 = vpop.f32.mrb[16].mxu0  ;;  %v684_v9 = vpop.f32.mrb[16].mxu1 }
 0x174   :  { %v691_v10 = vadd.f32 %v643_v21, %v306_v7  ;;  %v705_v46 = vadd.f32 %v684_v9, %v379_v12  ;;  %v645_v39 = vpop.f32.mrb[17].mxu0  ;;  %v686_v50 = vpop.f32.mrb[17].mxu1 }
 0x175   :  { %v698_v28 = vadd.f32 %v645_v39, %v308_v63  ;;  %v707_v8 = vadd.f32 %v686_v50, %v381_v24  ;;  %v647_v6 = vpop.f32.mrb[18].mxu0  ;;  %v688_v22 = vpop.f32.mrb[18].mxu1 }
 0x176   :  { %v2012_v58 = vmul.f32 -1.442695, %v691_v10  ;;  %v648_v0 = vpop.f32.mrb[19].mxu0  ;;  %v689_v11 = vpop.f32.mrb[19].mxu1 }
 0x177   :  { %v2013_v14 = vmul.f32 -1.442695, %v698_v28  ;;  %v2014_v13 = vmul.f32 -1.442695, %v707_v8 }
 0x178   :  { %2260 = vpow2.f32 %v2012_v58 }
 0x179   :  { %2262 = vpow2.f32 %v2013_v14 }
 0x17a   :  { %2264 = vpow2.f32 %v2014_v13 }
 0x17b   :  { %2266 = vtanh.f32 %v705_v46  ;;  %v3402_v46 = vmov 0  }
 0x182   :  { %v2261_v15 = vpop.eup %2260 }
 0x183   :  { %v2263_v17 = vpop.eup %2262  ;;  %v695_v16 = vadd.f32 1.0, %v2261_v15 }
 0x184   :  { %v702_v18 = vadd.f32 1.0, %v2263_v17  ;;  %v2265_v12 = vpop.eup %2264 }
 0x185   :  { %2268 = vrcp.f32 %v695_v16  ;;  %v2267_v9 = vpop.eup %2266  ;;  %v711_v22 = vadd.f32 1.0, %v2265_v12 }
 0x186   :  { %2270 = vrcp.f32 %v702_v18 }
 0x187   :  { %2272 = vrcp.f32 %v711_v22 }
 0x18f   :  { %v2269_v19 = vpop.eup %2268 }
 0x190   :  { %v2271_v6 = vpop.eup %2270  ;;  %v715_v20 = vmul.f32 %v2269_v19, %v2267_v9 }
 0x191   :  { %v714_v50 = vmul.f32 0.0, %v2271_v6  ;;  %v2273_v28 = vpop.eup %2272 }
 0x193   :  { %v3003_v11 = vadd.f32 %v715_v20, %v714_v50 }
 0x195   :  { %2274 = vtanh.f32 %v3003_v11 }
 0x19f   :  { %v2275_v10 = vpop.eup %2274 }
 0x1a0   :  { %v718_v24 = vmul.f32 %v2275_v10, %v2273_v28 }
 0x1a2   :  { %v719_v0 = vpack.c.bf16 %v718_v24, %v718_v24 }
 0x1a4   :  { %753 = vmatmul.mubr.bf16.vlgmr.msra.gmra.mrb[20].mxu0 %v719_v0  ;;  %794 = vmatmul.mubr.bf16.vlgmr.msra.gmra.mrb[20].mxu1 %v719_v0 }
 0x1a5   :  { %832 = vmatpush1.bf16.msra.mxu0 %v2756_v29  ;;  %873 = vmatpush1.bf16.msra.mxu1 %v2758_v30 }
 0x1a6   :  { %833 = vmatprep.subr.bf16.mxu0 %v2760_v31  ;;  %874 = vmatprep.subr.bf16.mxu1 %v2764_v32 }
 0x1a7   :  { %863 = vmatprep.mubr.bf16.mxu0 %v3402_v46  ;;  %904 = vmatprep.mubr.bf16.mxu1 %v3402_v46 }
 0x1a9   :  { %834 = vmatpush1.bf16.msra.mxu0 %v2766_v33  ;;  %875 = vmatpush1.bf16.msra.mxu1 %v2770_v34 }
 0x1aa   :  { %835 = vmatprep.subr.bf16.mxu0 %v2774_v37  ;;  %876 = vmatprep.subr.bf16.mxu1 %v2778_v38 }
 0x1ad   :  { %836 = vmatpush1.bf16.msra.mxu0 %v2782_v40  ;;  %877 = vmatpush1.bf16.msra.mxu1 %v2786_v41 }
 0x1ae   :  { %837 = vmatprep.subr.bf16.mxu0 %v2790_v42  ;;  %878 = vmatprep.subr.bf16.mxu1 %v2792_v43 }
 0x1b1   :  { %838 = vmatpush1.bf16.msra.mxu0 %v2794_v44  ;;  %879 = vmatpush1.bf16.msra.mxu1 %v2798_v45 }
 0x1b2   :  { %839 = vmatprep.subr.bf16.mxu0 %v2802_v48  ;;  %880 = vmatprep.subr.bf16.mxu1 %v2806_v49 }
 0x1b5   :  { %840 = vmatpush1.bf16.msra.mxu0 %v2810_v51  ;;  %881 = vmatpush1.bf16.msra.mxu1 %v2812_v52 }
 0x1b6   :  { %841 = vmatprep.subr.bf16.mxu0 %v2816_v53  ;;  %882 = vmatprep.subr.bf16.mxu1 %v2820_v54 }
 0x1b9   :  { %842 = vmatpush1.bf16.msra.mxu0 %v2822_v55  ;;  %883 = vmatpush1.bf16.msra.mxu1 %v2824_v56 }
 0x1ba   :  { %843 = vmatprep.subr.bf16.mxu0 %v2828_v59  ;;  %884 = vmatprep.subr.bf16.mxu1 %v2830_v60 }
 0x1bd   :  { %844 = vmatpush1.bf16.msra.mxu0 %v2838_v61  ;;  %885 = vmatpush1.bf16.msra.mxu1 %v2840_v62 }
 0x1be   :  { %845 = vmatprep.subr.bf16.mxu0 %v2844_v1  ;;  %886 = vmatprep.subr.bf16.mxu1 %v2846_v2 }
 0x1c1   :  { %846 = vmatpush1.bf16.msra.mxu0 %v2852_v3  ;;  %887 = vmatpush1.bf16.msra.mxu1 %v2854_v4 }
 0x1c2   :  { %942 = vmatprep.subr.bf16.mxu0 %v2752_v26  ;;  %983 = vmatprep.subr.bf16.mxu1 %v2754_v27 }
 0x277   :  { %v754_v7 = vpop.f32.mrb[20].mxu0  ;;  %v795_v63 = vpop.f32.mrb[20].mxu1 }
 0x278   :  { %v802_v21 = vadd.f32 %v754_v7, %v2929_v23  ;;  %v816_v39 = vadd.f32 %v795_v63, %v2932_v25  ;;  %v756_v8 = vpop.f32.mrb[21].mxu0  ;;  %v797_v58 = vpop.f32.mrb[21].mxu1 }
 0x279   :  { %v809_v14 = vadd.f32 %v756_v8, %v2934_v35  ;;  %v818_v13 = vadd.f32 %v797_v58, %v2937_v36  ;;  %v758_v15 = vpop.f32.mrb[22].mxu0  ;;  %v799_v17 = vpop.f32.mrb[22].mxu1 }
 0x27a   :  { %v2015_v16 = vmul.f32 -1.442695, %v802_v21  ;;  %v759_v18 = vpop.f32.mrb[23].mxu0  ;;  %v800_v12 = vpop.f32.mrb[23].mxu1 }
 0x27b   :  { %v2016_v9 = vmul.f32 -1.442695, %v809_v14  ;;  %v2017_v19 = vmul.f32 -1.442695, %v818_v13 }
 0x27c   :  { %2276 = vpow2.f32 %v2015_v16  ;;  %v3403_v16 = vld [vmem:[#allocation22_spill] sm:$0xff] }
 0x27d   :  { %2278 = vpow2.f32 %v2016_v9 }
 0x27e   :  { %2280 = vpow2.f32 %v2017_v19 }
 0x27f   :  { %2282 = vtanh.f32 %v816_v39 }
 0x286   :  { %v2277_v6 = vpop.eup %2276 }
 0x287   :  { %v2279_v20 = vpop.eup %2278  ;;  %v806_v23 = vadd.f32 1.0, %v2277_v6 }
 0x288   :  { %v813_v25 = vadd.f32 1.0, %v2279_v20  ;;  %v2281_v35 = vpop.eup %2280 }
 0x289   :  { %2284 = vrcp.f32 %v806_v23  ;;  %v2283_v22 = vpop.eup %2282  ;;  %v822_v10 = vadd.f32 1.0, %v2281_v35 }
 0x28a   :  { %2286 = vrcp.f32 %v813_v25 }
 0x28b   :  { %2288 = vrcp.f32 %v822_v10 }
 0x293   :  { %v2285_v36 = vpop.eup %2284 }
 0x294   :  { %v2287_v50 = vpop.eup %2286  ;;  %v826_v28 = vmul.f32 %v2285_v36, %v2283_v22 }
 0x295   :  { %v825_v24 = vmul.f32 %v2287_v50, %v3003_v11  ;;  %v2289_v7 = vpop.eup %2288 }
 0x297   :  { %v3045_v0 = vadd.f32 %v826_v28, %v825_v24 }
 0x299   :  { %2290 = vtanh.f32 %v3045_v0 }
 0x2a3   :  { %v2291_v63 = vpop.eup %2290 }
 0x2a4   :  { %v829_v21 = vmul.f32 %v2291_v63, %v2289_v7 }
 0x2a6   :  { %v830_v39 = vpack.c.bf16 %v829_v21, %v829_v21 }
 0x2a8   :  { %864 = vmatmul.mubr.bf16.vlgmr.msra.gmra.mrb[24].mxu0 %v830_v39  ;;  %905 = vmatmul.mubr.bf16.vlgmr.msra.gmra.mrb[24].mxu1 %v830_v39 }
 0x2a9   :  { %943 = vmatpush1.bf16.msra.mxu0 %v2756_v29  ;;  %984 = vmatpush1.bf16.msra.mxu1 %v2758_v30 }
 0x2aa   :  { %944 = vmatprep.subr.bf16.mxu0 %v2760_v31  ;;  %985 = vmatprep.subr.bf16.mxu1 %v2764_v32 }
 0x2ab   :  { %974 = vmatprep.mubr.bf16.mxu0 %v3402_v46  ;;  %1015 = vmatprep.mubr.bf16.mxu1 %v3402_v46 }
 0x2ad   :  { %945 = vmatpush1.bf16.msra.mxu0 %v2766_v33  ;;  %986 = vmatpush1.bf16.msra.mxu1 %v2770_v34 }
 0x2ae   :  { %946 = vmatprep.subr.bf16.mxu0 %v2774_v37  ;;  %987 = vmatprep.subr.bf16.mxu1 %v2778_v38 }
 0x2b1   :  { %947 = vmatpush1.bf16.msra.mxu0 %v2782_v40  ;;  %988 = vmatpush1.bf16.msra.mxu1 %v2786_v41 }
 0x2b2   :  { %948 = vmatprep.subr.bf16.mxu0 %v2790_v42  ;;  %989 = vmatprep.subr.bf16.mxu1 %v2792_v43 }
 0x2b5   :  { %949 = vmatpush1.bf16.msra.mxu0 %v2794_v44  ;;  %990 = vmatpush1.bf16.msra.mxu1 %v2798_v45 }
 0x2b6   :  { %950 = vmatprep.subr.bf16.mxu0 %v2802_v48  ;;  %991 = vmatprep.subr.bf16.mxu1 %v2806_v49 }
 0x2b9   :  { %951 = vmatpush1.bf16.msra.mxu0 %v2810_v51  ;;  %992 = vmatpush1.bf16.msra.mxu1 %v2812_v52 }
 0x2ba   :  { %952 = vmatprep.subr.bf16.mxu0 %v2816_v53  ;;  %993 = vmatprep.subr.bf16.mxu1 %v2820_v54 }
 0x2bd   :  { %953 = vmatpush1.bf16.msra.mxu0 %v2822_v55  ;;  %994 = vmatpush1.bf16.msra.mxu1 %v2824_v56 }
 0x2be   :  { %954 = vmatprep.subr.bf16.mxu0 %v2828_v59  ;;  %995 = vmatprep.subr.bf16.mxu1 %v2830_v60 }
 0x2c1   :  { %955 = vmatpush1.bf16.msra.mxu0 %v2838_v61  ;;  %996 = vmatpush1.bf16.msra.mxu1 %v2840_v62 }
 0x2c2   :  { %956 = vmatprep.subr.bf16.mxu0 %v2844_v1  ;;  %997 = vmatprep.subr.bf16.mxu1 %v2846_v2 }
 0x2c5   :  { %957 = vmatpush1.bf16.msra.mxu0 %v2852_v3  ;;  %998 = vmatpush1.bf16.msra.mxu1 %v2854_v4 }
 0x2c6   :  { %1053 = vmatprep.subr.bf16.mxu0 %v2752_v26  ;;  %1094 = vmatprep.subr.bf16.mxu1 %v2754_v27 }
 0x37b   :  { %v865_v11 = vpop.f32.mrb[24].mxu0  ;;  %v906_v8 = vpop.f32.mrb[24].mxu1 }
 0x37c   :  { %v913_v58 = vadd.f32 %v865_v11, %v2939_v47  ;;  %v927_v14 = vadd.f32 %v906_v8, %v2942_v57  ;;  %v867_v13 = vpop.f32.mrb[25].mxu0  ;;  %v908_v15 = vpop.f32.mrb[25].mxu1 }
 0x37d   :  { %v920_v17 = vadd.f32 %v867_v13, %v2944_v5  ;;  %v929_v18 = vadd.f32 %v908_v15, %v3403_v16  ;;  %v869_v12 = vpop.f32.mrb[26].mxu0  ;;  %v910_v9 = vpop.f32.mrb[26].mxu1 }
 0x37e   :  { %v2018_v19 = vmul.f32 -1.442695, %v913_v58  ;;  %v870_v6 = vpop.f32.mrb[27].mxu0  ;;  %v911_v20 = vpop.f32.mrb[27].mxu1 }
 0x37f   :  { %v2019_v23 = vmul.f32 -1.442695, %v920_v17  ;;  %v2020_v25 = vmul.f32 -1.442695, %v929_v18 }
 0x380   :  { %2292 = vpow2.f32 %v2018_v19 }
 0x381   :  { %2294 = vpow2.f32 %v2019_v23 }
 0x382   :  { %2296 = vpow2.f32 %v2020_v25 }
 0x383   :  { %2298 = vtanh.f32 %v927_v14 }
 0x38a   :  { %v2293_v35 = vpop.eup %2292 }
 0x38b   :  { %v2295_v22 = vpop.eup %2294  ;;  %v917_v47 = vadd.f32 1.0, %v2293_v35 }
 0x38c   :  { %v924_v57 = vadd.f32 1.0, %v2295_v22  ;;  %v2297_v5 = vpop.eup %2296 }
 0x38d   :  { %2300 = vrcp.f32 %v917_v47  ;;  %v2299_v36 = vpop.eup %2298  ;;  %v933_v24 = vadd.f32 1.0, %v2297_v5 }
 0x38e   :  { %2302 = vrcp.f32 %v924_v57 }
 0x38f   :  { %2304 = vrcp.f32 %v933_v24  ;;  %v3135_v24 = vld [vmem:[#allocation8 + $0x8] ss:$16 sps:$4 sm:$0xff]  }
 0x397   :  { %v2301_v50 = vpop.eup %2300 }
 0x398   :  { %v2303_v28 = vpop.eup %2302  ;;  %v937_v10 = vmul.f32 %v2301_v50, %v2299_v36 }
 0x399   :  { %v936_v7 = vmul.f32 %v2303_v28, %v3045_v0  ;;  %v2305_v21 = vpop.eup %2304  ;;  %v3407_v0 = vld [vmem:[#allocation26_spill] sm:$0xff] }
 0x39b   :  { %v3087_v63 = vadd.f32 %v937_v10, %v936_v7  ;;  %v3132_v10 = vld [vmem:[#allocation8] ss:$16 sps:$4 sm:$0xff]   ;;  %v3138_v7 = vld [vmem:[#allocation8 + $0x24] ss:$16 sps:$4 sm:$0xff]  }
 0x39d   :  { %2306 = vtanh.f32 %v3087_v63 }
 0x3a7   :  { %v2307_v39 = vpop.eup %2306 }
 0x3a8   :  { %v940_v11 = vmul.f32 %v2307_v39, %v2305_v21  ;;  %v3146_v21 = vld [vmem:[#allocation8 + $0x20] ss:$16 sps:$4 sm:$0xff]   ;;  %v3149_v39 = vld [vmem:[#allocation8 + $0x28] ss:$16 sps:$4 sm:$0xff]  }
 0x3aa   :  { %v941_v8 = vpack.c.bf16 %v940_v11, %v940_v11  ;;  %v3152_v11 = vld [vmem:[#allocation8 + $0x44] ss:$16 sps:$4 sm:$0xff]  }
 0x3ac   :  { %975 = vmatmul.mubr.bf16.vlgmr.msra.gmra.mrb[28].mxu0 %v941_v8  ;;  %1016 = vmatmul.mubr.bf16.vlgmr.msra.gmra.mrb[28].mxu1 %v941_v8  ;;  %v3155_v8 = vld [vmem:[#allocation8 + $0x4c] ss:$16 sps:$4 sm:$0xff]  }
 0x3ad   :  { %1054 = vmatpush1.bf16.msra.mxu0 %v2756_v29  ;;  %1095 = vmatpush1.bf16.msra.mxu1 %v2758_v30 }
 0x3ae   :  { %1055 = vmatprep.subr.bf16.mxu0 %v2760_v31  ;;  %1096 = vmatprep.subr.bf16.mxu1 %v2764_v32  ;;  %v3404_v31 = vld [vmem:[#allocation23_spill] sm:$0xff] }
 0x3af   :  { %1085 = vmatprep.mubr.bf16.mxu0 %v3402_v46  ;;  %1126 = vmatprep.mubr.bf16.mxu1 %v3402_v46 }
 0x3b1   :  { %1056 = vmatpush1.bf16.msra.mxu0 %v2766_v33  ;;  %1097 = vmatpush1.bf16.msra.mxu1 %v2770_v34  ;;  %v3405_v33 = vld [vmem:[#allocation24_spill] sm:$0xff] }
 0x3b2   :  { %1057 = vmatprep.subr.bf16.mxu0 %v2774_v37  ;;  %1098 = vmatprep.subr.bf16.mxu1 %v2778_v38 }
 0x3b5   :  { %1058 = vmatpush1.bf16.msra.mxu0 %v2782_v40  ;;  %1099 = vmatpush1.bf16.msra.mxu1 %v2786_v41  ;;  %v3406_v40 = vld [vmem:[#allocation25_spill] sm:$0xff] }
 0x3b6   :  { %1059 = vmatprep.subr.bf16.mxu0 %v2790_v42  ;;  %1100 = vmatprep.subr.bf16.mxu1 %v2792_v43 }
 0x3b9   :  { %1060 = vmatpush1.bf16.msra.mxu0 %v2794_v44  ;;  %1101 = vmatpush1.bf16.msra.mxu1 %v2798_v45 }
 0x3ba   :  { %1061 = vmatprep.subr.bf16.mxu0 %v2802_v48  ;;  %1102 = vmatprep.subr.bf16.mxu1 %v2806_v49 }
 0x3bd   :  { %1062 = vmatpush1.bf16.msra.mxu0 %v2810_v51  ;;  %1103 = vmatpush1.bf16.msra.mxu1 %v2812_v52 }
 0x3be   :  { %1063 = vmatprep.subr.bf16.mxu0 %v2816_v53  ;;  %1104 = vmatprep.subr.bf16.mxu1 %v2820_v54 }
 0x3c1   :  { %1064 = vmatpush1.bf16.msra.mxu0 %v2822_v55  ;;  %1105 = vmatpush1.bf16.msra.mxu1 %v2824_v56 }
 0x3c2   :  { %1065 = vmatprep.subr.bf16.mxu0 %v2828_v59  ;;  %1106 = vmatprep.subr.bf16.mxu1 %v2830_v60 }
 0x3c5   :  { %1066 = vmatpush1.bf16.msra.mxu0 %v2838_v61  ;;  %1107 = vmatpush1.bf16.msra.mxu1 %v2840_v62 }
 0x3c6   :  { %1067 = vmatprep.subr.bf16.mxu0 %v2844_v1  ;;  %1108 = vmatprep.subr.bf16.mxu1 %v2846_v2 }
 0x3c9   :  { %1068 = vmatpush1.bf16.msra.mxu0 %v2852_v3  ;;  %1109 = vmatpush1.bf16.msra.mxu1 %v2854_v4 }
 0x3ca   :  { %1164 = vmatprep.subr.bf16.mxu0 %v2752_v26  ;;  %1205 = vmatprep.subr.bf16.mxu1 %v2754_v27 }
 0x47f   :  { %v976_v29 = vpop.f32.mrb[28].mxu0  ;;  %v1017_v30 = vpop.f32.mrb[28].mxu1 }
 0x480   :  { %v1024_v32 = vadd.f32 %v976_v29, %v3404_v31  ;;  %v1038_v34 = vadd.f32 %v1017_v30, %v3405_v33  ;;  %v978_v37 = vpop.f32.mrb[29].mxu0  ;;  %v1019_v38 = vpop.f32.mrb[29].mxu1  ;;  %v3158_v29 = vld [vmem:[#allocation8 + $0x40] ss:$16 sps:$4 sm:$0xff]   ;;  %v3161_v30 = vld [vmem:[#allocation8 + $0x48] ss:$16 sps:$4 sm:$0xff]  }
 0x481   :  { %v1031_v41 = vadd.f32 %v978_v37, %v3406_v40  ;;  %v1040_v58 = vadd.f32 %v1019_v38, %v3407_v0  ;;  %v980_v14 = vpop.f32.mrb[30].mxu0  ;;  %v1021_v13 = vpop.f32.mrb[30].mxu1 }
 0x482   :  { %v2021_v15 = vmul.f32 -1.442695, %v1024_v32  ;;  %v981_v17 = vpop.f32.mrb[31].mxu0  ;;  %v1022_v16 = vpop.f32.mrb[31].mxu1 }
 0x483   :  { %v2022_v26 = vmul.f32 -1.442695, %v1031_v41  ;;  %v2023_v27 = vmul.f32 -1.442695, %v1040_v58 }
 0x484   :  { %2308 = vpow2.f32 %v2021_v15 }
 0x485   :  { %2310 = vpow2.f32 %v2022_v26 }
 0x486   :  { %2312 = vpow2.f32 %v2023_v27 }
 0x487   :  { %2314 = vtanh.f32 %v1038_v34 }
 0x48e   :  { %v2309_v18 = vpop.eup %2308 }
 0x48f   :  { %v2311_v12 = vpop.eup %2310  ;;  %v1028_v9 = vadd.f32 1.0, %v2309_v18  ;;  %v3210_v18 = vld [vmem:[#allocation8 + $0x64] ss:$16 sps:$4 sm:$0xff]  }
 0x490   :  { %v1035_v19 = vadd.f32 1.0, %v2311_v12  ;;  %v2313_v6 = vpop.eup %2312  ;;  %v3213_v12 = vld [vmem:[#allocation8 + $0x6c] ss:$16 sps:$4 sm:$0xff]  }
 0x491   :  { %2316 = vrcp.f32 %v1028_v9  ;;  %v2315_v20 = vpop.eup %2314  ;;  %v1044_v22 = vadd.f32 1.0, %v2313_v6  ;;  %v3216_v9 = vld [vmem:[#allocation8 + $0x60] ss:$16 sps:$4 sm:$0xff]   ;;  %v3222_v6 = vld [vmem:[#allocation8 + $0x84] ss:$16 sps:$4 sm:$0xff]  }
 0x492   :  { %2318 = vrcp.f32 %v1035_v19  ;;  %v3219_v19 = vld [vmem:[#allocation8 + $0x68] ss:$16 sps:$4 sm:$0xff]  }
 0x493   :  { %2320 = vrcp.f32 %v1044_v22  ;;  %v3237_v22 = vld [vmem:[#allocation8 + $0xac] ss:$16 sps:$4 sm:$0xff]  }
 0x49b   :  { %v2317_v23 = vpop.eup %2316 }
 0x49c   :  { %v2319_v25 = vpop.eup %2318  ;;  %v1048_v35 = vmul.f32 %v2317_v23, %v2315_v20  ;;  %v3225_v20 = vld [vmem:[#allocation8 + $0x8c] ss:$16 sps:$4 sm:$0xff]   ;;  %v3228_v23 = vld [vmem:[#allocation8 + $0x80] ss:$16 sps:$4 sm:$0xff]  }
 0x49d   :  { %v1047_v47 = vmul.f32 %v2319_v25, %v3087_v63  ;;  %v2321_v5 = vpop.eup %2320  ;;  %v3141_v63 = vld [vmem:[#allocation8 + $0x2c] ss:$16 sps:$4 sm:$0xff]   ;;  %v3231_v25 = vld [vmem:[#allocation8 + $0x88] ss:$16 sps:$4 sm:$0xff]  }
 0x49f   :  { %v3129_v57 = vadd.f32 %v1048_v35, %v1047_v47  ;;  %v3234_v35 = vld [vmem:[#allocation8 + $0xa4] ss:$16 sps:$4 sm:$0xff]   ;;  %v3240_v47 = vld [vmem:[#allocation8 + $0xa0] ss:$16 sps:$4 sm:$0xff]  }
 0x4a1   :  { %2322 = vtanh.f32 %v3129_v57 }
 0x4ab   :  { %v2323_v36 = vpop.eup %2322 }
 0x4ac   :  { %v1051_v50 = vmul.f32 %v2323_v36, %v2321_v5  ;;  %v3246_v5 = vld [vmem:[#allocation8 + $0xc4] ss:$16 sps:$4 sm:$0xff]   ;;  %v3249_v36 = vld [vmem:[#allocation8 + $0xcc] ss:$16 sps:$4 sm:$0xff]  }
 0x4ae   :  { %v1052_v28 = vpack.c.bf16 %v1051_v50, %v1051_v50  ;;  %v3252_v50 = vld [vmem:[#allocation8 + $0xc0] ss:$16 sps:$4 sm:$0xff]  }
 0x4b0   :  { %1086 = vmatmul.mubr.bf16.vlgmr.msra.gmra.mrb[32].mxu0 %v1052_v28  ;;  %1127 = vmatmul.mubr.bf16.vlgmr.msra.gmra.mrb[32].mxu1 %v1052_v28  ;;  %v3255_v28 = vld [vmem:[#allocation8 + $0xc8] ss:$16 sps:$4 sm:$0xff]  }
 0x4b1   :  { %1165 = vmatpush1.bf16.msra.mxu0 %v3132_v10  ;;  %1206 = vmatpush1.bf16.msra.mxu1 %v3135_v24 }
 0x4b2   :  { %1166 = vmatprep.subr.bf16.mxu0 %v3138_v7  ;;  %1207 = vmatprep.subr.bf16.mxu1 %v3141_v63 }
 0x4b3   :  { %1196 = vmatprep.mubr.bf16.mxu0 %v3402_v46  ;;  %1237 = vmatprep.mubr.bf16.mxu1 %v3402_v46 }
 0x4b5   :  { %1167 = vmatpush1.bf16.msra.mxu0 %v3146_v21  ;;  %1208 = vmatpush1.bf16.msra.mxu1 %v3149_v39 }
 0x4b6   :  { %1168 = vmatprep.subr.bf16.mxu0 %v3152_v11  ;;  %1209 = vmatprep.subr.bf16.mxu1 %v3155_v8 }
 0x4b9   :  { %1169 = vmatpush1.bf16.msra.mxu0 %v3158_v29  ;;  %1210 = vmatpush1.bf16.msra.mxu1 %v3161_v30 }
 0x4ba   :  { %1170 = vmatprep.subr.bf16.mxu0 %v2790_v42  ;;  %1211 = vmatprep.subr.bf16.mxu1 %v2792_v43  ;;  %v3184_v42 = vld [vmem:[#allocation8 + $0x4] ss:$16 sps:$4 sm:$0xff]   ;;  %v3187_v43 = vld [vmem:[#allocation8 + $0xc] ss:$16 sps:$4 sm:$0xff]  }
 0x4bd   :  { %1171 = vmatpush1.bf16.msra.mxu0 %v2794_v44  ;;  %1212 = vmatpush1.bf16.msra.mxu1 %v2798_v45 }
 0x4be   :  { %1172 = vmatprep.subr.bf16.mxu0 %v2802_v48  ;;  %1213 = vmatprep.subr.bf16.mxu1 %v2806_v49  ;;  %v3408_v48 = vld [vmem:[#allocation27_spill] sm:$0xff] }
 0x4c1   :  { %1173 = vmatpush1.bf16.msra.mxu0 %v2810_v51  ;;  %1214 = vmatpush1.bf16.msra.mxu1 %v2812_v52  ;;  %v3409_v51 = vld [vmem:[#allocation28_spill] sm:$0xff] }
 0x4c2   :  { %1174 = vmatprep.subr.bf16.mxu0 %v2816_v53  ;;  %1215 = vmatprep.subr.bf16.mxu1 %v2820_v54 }
 0x4c5   :  { %1175 = vmatpush1.bf16.msra.mxu0 %v2822_v55  ;;  %1216 = vmatpush1.bf16.msra.mxu1 %v2824_v56  ;;  %v3410_v55 = vld [vmem:[#allocation29_spill] sm:$0xff] }
 0x4c6   :  { %1176 = vmatprep.subr.bf16.mxu0 %v2828_v59  ;;  %1217 = vmatprep.subr.bf16.mxu1 %v2830_v60  ;;  %v3411_v59 = vld [vmem:[#allocation30_spill] sm:$0xff] }
 0x4c9   :  { %1177 = vmatpush1.bf16.msra.mxu0 %v2838_v61  ;;  %1218 = vmatpush1.bf16.msra.mxu1 %v2840_v62 }
 0x4ca   :  { %1178 = vmatprep.subr.bf16.mxu0 %v2844_v1  ;;  %1219 = vmatprep.subr.bf16.mxu1 %v2846_v2 }
 0x4cd   :  { %1179 = vmatpush1.bf16.msra.mxu0 %v2852_v3  ;;  %1220 = vmatpush1.bf16.msra.mxu1 %v2854_v4 }
 0x4ce   :  { %1275 = vmatprep.subr.bf16.mxu0 %v3184_v42  ;;  %1316 = vmatprep.subr.bf16.mxu1 %v3187_v43 }
 0x583   :  { %v1087_v44 = vpop.f32.mrb[32].mxu0  ;;  %v1128_v45 = vpop.f32.mrb[32].mxu1 }
 0x584   :  { %v1135_v49 = vadd.f32 %v1087_v44, %v3408_v48  ;;  %v1149_v52 = vadd.f32 %v1128_v45, %v3409_v51  ;;  %v1089_v53 = vpop.f32.mrb[33].mxu0  ;;  %v1130_v54 = vpop.f32.mrb[33].mxu1  ;;  %v3258_v44 = vld [vmem:[#allocation8 + $0xe4] ss:$16 sps:$4 sm:$0xff]   ;;  %v3261_v45 = vld [vmem:[#allocation8 + $0xec] ss:$16 sps:$4 sm:$0xff]  }
 0x585   :  { %v1142_v56 = vadd.f32 %v1089_v53, %v3410_v55  ;;  %v1151_v60 = vadd.f32 %v1130_v54, %v3411_v59  ;;  %v1091_v61 = vpop.f32.mrb[34].mxu0  ;;  %v1132_v62 = vpop.f32.mrb[34].mxu1  ;;  %v3264_v48 = vld [vmem:[#allocation8 + $0xe0] ss:$16 sps:$4 sm:$0xff]   ;;  %v3412_v53 = vld [vmem:[#allocation31_spill] sm:$0xff] }
 0x586   :  { %v2024_v1 = vmul.f32 -1.442695, %v1135_v49  ;;  %v1092_v2 = vpop.f32.mrb[35].mxu0  ;;  %v1133_v3 = vpop.f32.mrb[35].mxu1  ;;  %v3267_v49 = vld [vmem:[#allocation8 + $0xe8] ss:$16 sps:$4 sm:$0xff]  }
 0x587   :  { %v2025_v4 = vmul.f32 -1.442695, %v1142_v56  ;;  %v2026_v31 = vmul.f32 -1.442695, %v1151_v60  ;;  %v3413_v55 = vld [vmem:[#allocation32_spill] sm:$0xff]  ;;  %v3414_v61 = vld [vmem:[#allocation33_spill] sm:$0xff] }
 0x588   :  { %2324 = vpow2.f32 %v2024_v1  ;;  %v3415_v1 = vld [vmem:[#allocation34_spill] sm:$0xff] }
 0x589   :  { %2326 = vpow2.f32 %v2025_v4 }
 0x58a   :  { %2328 = vpow2.f32 %v2026_v31 }
 0x58b   :  { %2330 = vtanh.f32 %v1149_v52 }
 0x592   :  { %v2325_v32 = vpop.eup %2324 }
 0x593   :  { %v2327_v33 = vpop.eup %2326  ;;  %v1139_v34 = vadd.f32 1.0, %v2325_v32 }
 0x594   :  { %v1146_v37 = vadd.f32 1.0, %v2327_v33  ;;  %v2329_v38 = vpop.eup %2328 }
 0x595   :  { %2332 = vrcp.f32 %v1139_v34  ;;  %v2331_v40 = vpop.eup %2330  ;;  %v1155_v14 = vadd.f32 1.0, %v2329_v38 }
 0x596   :  { %2334 = vrcp.f32 %v1146_v37 }
 0x597   :  { %2336 = vrcp.f32 %v1155_v14 }
 0x59f   :  { %v2333_v41 = vpop.eup %2332 }
 0x5a0   :  { %v2335_v0 = vpop.eup %2334  ;;  %v1159_v58 = vmul.f32 %v2333_v41, %v2331_v40 }
 0x5a1   :  { %v1158_v13 = vmul.f32 %v2335_v0, %v3129_v57  ;;  %v2337_v17 = vpop.eup %2336  ;;  %v3243_v57 = vld [vmem:[#allocation8 + $0xa8] ss:$16 sps:$4 sm:$0xff]  }
 0x5a3   :  { %v3195_v15 = vadd.f32 %v1159_v58, %v1158_v13 }
 0x5a5   :  { %2338 = vtanh.f32 %v3195_v15 }
 0x5af   :  { %v2339_v16 = vpop.eup %2338 }
 0x5b0   :  { %v1162_v26 = vmul.f32 %v2339_v16, %v2337_v17 }
 0x5b2   :  { %v1163_v27 = vpack.c.bf16 %v1162_v26, %v1162_v26 }
 0x5b4   :  { %1197 = vmatmul.mubr.bf16.vlgmr.msra.gmra.mrb[36].mxu0 %v1163_v27  ;;  %1238 = vmatmul.mubr.bf16.vlgmr.msra.gmra.mrb[36].mxu1 %v1163_v27 }
 0x5b5   :  { %1276 = vmatpush1.bf16.msra.mxu0 %v3132_v10  ;;  %1317 = vmatpush1.bf16.msra.mxu1 %v3135_v24 }
 0x5b6   :  { %1277 = vmatprep.subr.bf16.mxu0 %v3138_v7  ;;  %1318 = vmatprep.subr.bf16.mxu1 %v3141_v63 }
 0x5b7   :  { %1307 = vmatprep.mubr.bf16.mxu0 %v3402_v46  ;;  %1348 = vmatprep.mubr.bf16.mxu1 %v3402_v46 }
 0x5b9   :  { %1278 = vmatpush1.bf16.msra.mxu0 %v3146_v21  ;;  %1319 = vmatpush1.bf16.msra.mxu1 %v3149_v39 }
 0x5ba   :  { %1279 = vmatprep.subr.bf16.mxu0 %v3152_v11  ;;  %1320 = vmatprep.subr.bf16.mxu1 %v3155_v8 }
 0x5bd   :  { %1280 = vmatpush1.bf16.msra.mxu0 %v3158_v29  ;;  %1321 = vmatpush1.bf16.msra.mxu1 %v3161_v30 }
 0x5be   :  { %1281 = vmatprep.subr.bf16.mxu0 %v3210_v18  ;;  %1322 = vmatprep.subr.bf16.mxu1 %v3213_v12 }
 0x5c1   :  { %1282 = vmatpush1.bf16.msra.mxu0 %v3216_v9  ;;  %1323 = vmatpush1.bf16.msra.mxu1 %v3219_v19 }
 0x5c2   :  { %1283 = vmatprep.subr.bf16.mxu0 %v3222_v6  ;;  %1324 = vmatprep.subr.bf16.mxu1 %v3225_v20 }
 0x5c5   :  { %1284 = vmatpush1.bf16.msra.mxu0 %v3228_v23  ;;  %1325 = vmatpush1.bf16.msra.mxu1 %v3231_v25 }
 0x5c6   :  { %1285 = vmatprep.subr.bf16.mxu0 %v3234_v35  ;;  %1326 = vmatprep.subr.bf16.mxu1 %v3237_v22 }
 0x5c9   :  { %1286 = vmatpush1.bf16.msra.mxu0 %v3240_v47  ;;  %1327 = vmatpush1.bf16.msra.mxu1 %v3243_v57 }
 0x5ca   :  { %1287 = vmatprep.subr.bf16.mxu0 %v3246_v5  ;;  %1328 = vmatprep.subr.bf16.mxu1 %v3249_v36 }
 0x5cd   :  { %1288 = vmatpush1.bf16.msra.mxu0 %v3252_v50  ;;  %1329 = vmatpush1.bf16.msra.mxu1 %v3255_v28 }
 0x5ce   :  { %1289 = vmatprep.subr.bf16.mxu0 %v3258_v44  ;;  %1330 = vmatprep.subr.bf16.mxu1 %v3261_v45 }
 0x5d1   :  { %1290 = vmatpush1.bf16.msra.mxu0 %v3264_v48  ;;  %1331 = vmatpush1.bf16.msra.mxu1 %v3267_v49 }
 0x5d2   :  { %1386 = vmatprep.subr.bf16.mxu0 %v3184_v42  ;;  %1427 = vmatprep.subr.bf16.mxu1 %v3187_v43 }
 0x687   :  { %v1198_v51 = vpop.f32.mrb[36].mxu0  ;;  %v1239_v52 = vpop.f32.mrb[36].mxu1 }
 0x688   :  { %v1246_v54 = vadd.f32 %v1198_v51, %v3412_v53  ;;  %v1260_v56 = vadd.f32 %v1239_v52, %v3413_v55  ;;  %v1200_v59 = vpop.f32.mrb[37].mxu0  ;;  %v1241_v60 = vpop.f32.mrb[37].mxu1 }
 0x689   :  { %v1253_v62 = vadd.f32 %v1200_v59, %v3414_v61  ;;  %v1262_v2 = vadd.f32 %v1241_v60, %v3415_v1  ;;  %v1202_v3 = vpop.f32.mrb[38].mxu0  ;;  %v1243_v4 = vpop.f32.mrb[38].mxu1  ;;  %v2220_v61 = vld [vmem:[#allocation7] ss:$16 sps:$4 sm:$0xff]  }
 0x68a   :  { %v2027_v31 = vmul.f32 -1.442695, %v1246_v54  ;;  %v1203_v32 = vpop.f32.mrb[39].mxu0  ;;  %v1244_v33 = vpop.f32.mrb[39].mxu1  ;;  %v2237_v3 = vld [vmem:[#allocation7 + $0x2c] ss:$16 sps:$4 sm:$0xff]  }
 0x68b   :  { %v2028_v42 = vmul.f32 -1.442695, %v1253_v62  ;;  %v2029_v43 = vmul.f32 -1.442695, %v1262_v2  ;;  %v2229_v62 = vld [vmem:[#allocation7 + $0x8] ss:$16 sps:$4 sm:$0xff]  }
 0x68c   :  { %2340 = vpow2.f32 %v2027_v31  ;;  %v2225_v2 = vld [vmem:[#allocation7 + $0x24] ss:$16 sps:$4 sm:$0xff]   ;;  %v2223_v4 = vld [vmem:[#allocation7 + $0x20] ss:$16 sps:$4 sm:$0xff]   ;;  %v2235_v32 = vld [vmem:[#allocation7 + $0x28] ss:$16 sps:$4 sm:$0xff]  }
 0x68d   :  { %2342 = vpow2.f32 %v2028_v42  ;;  %v2228_v31 = vld [vmem:[#allocation7 + $0x44] ss:$16 sps:$4 sm:$0xff]   ;;  %v2240_v42 = vld [vmem:[#allocation7 + $0x4c] ss:$16 sps:$4 sm:$0xff]  }
 0x68e   :  { %2344 = vpow2.f32 %v2029_v43  ;;  %v2234_v33 = vld [vmem:[#allocation7 + $0x64] ss:$16 sps:$4 sm:$0xff]   ;;  %v2243_v43 = vld [vmem:[#allocation7 + $0x6c] ss:$16 sps:$4 sm:$0xff]  }
 0x68f   :  { %2346 = vtanh.f32 %v1260_v56 }
 0x696   :  { %v2341_v34 = vpop.eup %2340 }
 0x697   :  { %v2343_v37 = vpop.eup %2342  ;;  %v1250_v38 = vadd.f32 1.0, %v2341_v34  ;;  %v2226_v34 = vld [vmem:[#allocation7 + $0x40] ss:$16 sps:$4 sm:$0xff]  }
 0x698   :  { %v1257_v40 = vadd.f32 1.0, %v2343_v37  ;;  %v2345_v41 = vpop.eup %2344  ;;  %v2232_v37 = vld [vmem:[#allocation7 + $0x60] ss:$16 sps:$4 sm:$0xff]  }
 0x699   :  { %2348 = vrcp.f32 %v1250_v38  ;;  %v2347_v0 = vpop.eup %2346  ;;  %v1266_v17 = vadd.f32 1.0, %v2345_v41  ;;  %v2238_v38 = vld [vmem:[#allocation7 + $0x48] ss:$16 sps:$4 sm:$0xff]  }
 0x69a   :  { %2350 = vrcp.f32 %v1257_v40  ;;  %v2241_v40 = vld [vmem:[#allocation7 + $0x68] ss:$16 sps:$4 sm:$0xff]  }
 0x69b   :  { %2352 = vrcp.f32 %v1266_v17  ;;  %v3420_v41 = vld [vmem:[#allocation19_spill] sm:$0xff] }
 0x6a3   :  { %v2349_v58 = vpop.eup %2348 }
 0x6a4   :  { %v2351_v14 = vpop.eup %2350  ;;  %v1270_v13 = vmul.f32 %v2349_v58, %v2347_v0  ;;  %v1614_v0 = vand.u32 %v2234_v33, %v3420_v41  ;;  %v1620_v58 = vand.u32 %v2243_v43, %v3420_v41 }
 0x6a5   :  { %v1269_v16 = vmul.f32 %v2351_v14, %v3195_v15  ;;  %v2353_v27 = vpop.eup %2352  ;;  %v3418_v15 = vld [vmem:[#allocation37_spill] sm:$0xff]  ;;  %v1611_v14 = vand.u32 %v2232_v37, %v3420_v41 }
 0x6a7   :  { %v3277_v26 = vadd.f32 %v1270_v13, %v1269_v16  ;;  %v1617_v13 = vand.u32 %v2241_v40, %v3420_v41  ;;  %v2244_v16 = vld [vmem:[#allocation10] sm:$0xff]  }
 0x6a9   :  { %2354 = vtanh.f32 %v3277_v26 }
 0x6b3   :  { %v2355_v51 = vpop.eup %2354 }
 0x6b4   :  { %v1273_v52 = vmul.f32 %v2355_v51, %v2353_v27  ;;  %v2245_v27 = vld [vmem:[#allocation10 + $0x8] sm:$0xff]   ;;  %v2246_v51 = vld [vmem:[#allocation10 + $0x10] sm:$0xff]  }
 0x6b6   :  { %v1274_v53 = vpack.c.bf16 %v1273_v52, %v1273_v52  ;;  %v2247_v52 = vld [vmem:[#allocation11] sm:$0xff]  }
 0x6b8   :  { %1308 = vmatmul.mubr.bf16.vlgmr.msra.gmra.mrb[40].mxu0 %v1274_v53  ;;  %1349 = vmatmul.mubr.bf16.vlgmr.msra.gmra.mrb[40].mxu1 %v1274_v53  ;;  %v2248_v53 = vld [vmem:[#allocation10 + $0x18] sm:$0xff]  }
 0x6b9   :  { %1387 = vmatpush1.bf16.msra.mxu0 %v3132_v10  ;;  %1428 = vmatpush1.bf16.msra.mxu1 %v3135_v24  ;;  %v2222_v10 = vld [vmem:[#allocation7 + $0x4] ss:$16 sps:$4 sm:$0xff]   ;;  %v2231_v24 = vld [vmem:[#allocation7 + $0xc] ss:$16 sps:$4 sm:$0xff]  }
 0x6ba   :  { %1388 = vmatprep.subr.bf16.mxu0 %v3138_v7  ;;  %1429 = vmatprep.subr.bf16.mxu1 %v3141_v63 }
 0x6bb   :  { %1418 = vmatprep.mubr.bf16.mxu0 %v3402_v46  ;;  %1459 = vmatprep.mubr.bf16.mxu1 %v3402_v46 }
 0x6bd   :  { %1389 = vmatpush1.bf16.msra.mxu0 %v3146_v21  ;;  %1430 = vmatpush1.bf16.msra.mxu1 %v3149_v39  ;;  %v3416_v21 = vld [vmem:[#allocation35_spill] sm:$0xff] }
 0x6be   :  { %1390 = vmatprep.subr.bf16.mxu0 %v3152_v11  ;;  %1431 = vmatprep.subr.bf16.mxu1 %v3155_v8  ;;  %v3417_v11 = vld [vmem:[#allocation36_spill] sm:$0xff] }
 0x6c1   :  { %1391 = vmatpush1.bf16.msra.mxu0 %v3158_v29  ;;  %1432 = vmatpush1.bf16.msra.mxu1 %v3161_v30 }
 0x6c2   :  { %1392 = vmatprep.subr.bf16.mxu0 %v3210_v18  ;;  %1433 = vmatprep.subr.bf16.mxu1 %v3213_v12  ;;  %v3419_v12 = vld [vmem:[#allocation38_spill] sm:$0xff] }
 0x6c5   :  { %1393 = vmatpush1.bf16.msra.mxu0 %v3216_v9  ;;  %1434 = vmatpush1.bf16.msra.mxu1 %v3219_v19 }
 0x6c6   :  { %1394 = vmatprep.subr.bf16.mxu0 %v3222_v6  ;;  %1435 = vmatprep.subr.bf16.mxu1 %v3225_v20 }
 0x6c9   :  { %1395 = vmatpush1.bf16.msra.mxu0 %v3228_v23  ;;  %1436 = vmatpush1.bf16.msra.mxu1 %v3231_v25 }
 0x6ca   :  { %1396 = vmatprep.subr.bf16.mxu0 %v3234_v35  ;;  %1437 = vmatprep.subr.bf16.mxu1 %v3237_v22 }
 0x6cd   :  { %1397 = vmatpush1.bf16.msra.mxu0 %v3240_v47  ;;  %1438 = vmatpush1.bf16.msra.mxu1 %v3243_v57 }
 0x6ce   :  { %1398 = vmatprep.subr.bf16.mxu0 %v3246_v5  ;;  %1439 = vmatprep.subr.bf16.mxu1 %v3249_v36 }
 0x6d1   :  { %1399 = vmatpush1.bf16.msra.mxu0 %v3252_v50  ;;  %1440 = vmatpush1.bf16.msra.mxu1 %v3255_v28 }
 0x6d2   :  { %1400 = vmatprep.subr.bf16.mxu0 %v3258_v44  ;;  %1441 = vmatprep.subr.bf16.mxu1 %v3261_v45 }
 0x6d5   :  { %1401 = vmatpush1.bf16.msra.mxu0 %v3264_v48  ;;  %1442 = vmatpush1.bf16.msra.mxu1 %v3267_v49 }
 0x6d6   :  { %1622 = vmatprep.subr.bf16.mxu0 %v2222_v10  ;;  %1662 = vmatprep.subr.bf16.mxu1 %v2231_v24  ;;  %v2249_v10 = vld [vmem:[#allocation11 + $0x8] sm:$0xff]   ;;  %v2250_v24 = vld [vmem:[#allocation10 + $0x20] sm:$0xff]  }
 0x78b   :  { %v1309_v7 = vpop.f32.mrb[40].mxu0  ;;  %v1350_v63 = vpop.f32.mrb[40].mxu1 }
 0x78c   :  { %v1357_v39 = vadd.f32 %v1309_v7, %v3416_v21  ;;  %v1371_v8 = vadd.f32 %v1350_v63, %v3417_v11  ;;  %v1311_v29 = vpop.f32.mrb[41].mxu0  ;;  %v1352_v30 = vpop.f32.mrb[41].mxu1  ;;  %v2251_v7 = vld [vmem:[#allocation11 + $0x10] sm:$0xff]   ;;  %v2252_v63 = vld [vmem:[#allocation10 + $0x28] sm:$0xff]   ;;  %v2253_v21 = vld [vmem:[#allocation11 + $0x18] sm:$0xff]  }
 0x78d   :  { %v1364_v18 = vadd.f32 %v1311_v29, %v3418_v15  ;;  %v1373_v9 = vadd.f32 %v1352_v30, %v3419_v12  ;;  %v1313_v19 = vpop.f32.mrb[42].mxu0  ;;  %v1354_v6 = vpop.f32.mrb[42].mxu1  ;;  %v2255_v11 = vld [vmem:[#allocation11 + $0x20] sm:$0xff]   ;;  %v2257_v29 = vld [vmem:[#allocation11 + $0x28] sm:$0xff]   ;;  %v2258_v30 = vld [vmem:[#allocation11 + $0x30] sm:$0xff]  }
 0x78e   :  { %v2030_v20 = vmul.f32 -1.442695, %v1357_v39  ;;  %v1314_v23 = vpop.f32.mrb[43].mxu0  ;;  %v1355_v25 = vpop.f32.mrb[43].mxu1  ;;  %v2254_v39 = vld [vmem:[#allocation10 + $0x30] sm:$0xff]   ;;  %v2259_v15 = vld [vmem:[#allocation11 + $0x38] sm:$0xff]  }
 0x78f   :  { %v2031_v35 = vmul.f32 -1.442695, %v1364_v18  ;;  %v2032_v22 = vmul.f32 -1.442695, %v1373_v9  ;;  %v3422_v9 = vld [vmem:[#allocation39_spill] sm:$0xff]  ;;  %v3423_v6 = vld [vmem:[#allocation40_spill] sm:$0xff] }
 0x790   :  { %2356 = vpow2.f32 %v2030_v20 }
 0x791   :  { %2358 = vpow2.f32 %v2031_v35  ;;  %v3424_v35 = vld [vmem:[#allocation41_spill] sm:$0xff] }
 0x792   :  { %2360 = vpow2.f32 %v2032_v22 }
 0x793   :  { %2362 = vtanh.f32 %v1371_v8  ;;  %v2256_v8 = vld [vmem:[#allocation10 + $0x38] sm:$0xff]  }
 0x79a   :  { %v2357_v47 = vpop.eup %2356 }
 0x79b   :  { %v2359_v57 = vpop.eup %2358  ;;  %v1361_v5 = vadd.f32 1.0, %v2357_v47  ;;  %v3425_v47 = vld [vmem:[#allocation42_spill] sm:$0xff] }
 0x79c   :  { %v1368_v36 = vadd.f32 1.0, %v2359_v57  ;;  %v2361_v50 = vpop.eup %2360 }
 0x79d   :  { %2364 = vrcp.f32 %v1361_v5  ;;  %v2363_v28 = vpop.eup %2362  ;;  %v1377_v49 = vadd.f32 1.0, %v2361_v50 }
 0x79e   :  { %2366 = vrcp.f32 %v1368_v36 }
 0x79f   :  { %2368 = vrcp.f32 %v1377_v49 }
 0x7a7   :  { %v2365_v44 = vpop.eup %2364 }
 0x7a8   :  { %v2367_v45 = vpop.eup %2366  ;;  %v1381_v48 = vmul.f32 %v2365_v44, %v2363_v28 }
 0x7a9   :  { %v1380_v54 = vmul.f32 %v2367_v45, %v3277_v26  ;;  %v2369_v56 = vpop.eup %2368  ;;  %v2610_v26 = vmov 0.0  }
 0x7ab   :  { %v3317_v55 = vadd.f32 %v1381_v48, %v1380_v54  ;;  %v1512_v48 = vld [vmem:[%s3362_s4] sm:$0xf]  ;;  %v3426_v54 = vld [vmem:[#allocation21_spill] sm:$0xff] }
 0x7ad   :  { %2370 = vtanh.f32 %v3317_v55 }
 0x7b7   :  { %v2371_v59 = vpop.eup %2370 }
 0x7b8   :  { %v1384_v60 = vmul.f32 %v2371_v59, %v2369_v56  ;;  %v3427_v56 = vsub.s32 0, %v3426_v54 }
 0x7ba   :  { %v1385_v1 = vpack.c.bf16 %v1384_v60, %v1384_v60  ;;  %v1517_v59 = vrot.slane %v1512_v48, %v3427_v56 }
 0x7bc   :  { %1419 = vmatmul.mubr.bf16.vlgmr.msra.gmra.mrb[44].mxu0 %v1385_v1  ;;  %1460 = vmatmul.mubr.bf16.vlgmr.msra.gmra.mrb[44].mxu1 %v1385_v1 }
 0x7bd   :  { %1623 = vmatpush1.bf16.msra.mxu0 %v2220_v61  ;;  %1663 = vmatpush1.bf16.msra.mxu1 %v2229_v62 }
 0x7be   :  { %1624 = vmatprep.subr.bf16.mxu0 %v2225_v2  ;;  %1664 = vmatprep.subr.bf16.mxu1 %v2237_v3 }
 0x7bf   :  { %1654 = vmatprep.mubr.bf16.mxu0 %v3402_v46  ;;  %1694 = vmatprep.mubr.bf16.mxu1 %v3402_v46  ;;  %v3421_v46 = vld [vmem:[#allocation20_spill] sm:$0xff] }
 0x7c0   :  { %v1530_v17 = vrot.slane %v3421_v46, 4 }
 0x7c1   :  { %1625 = vmatpush1.bf16.msra.mxu0 %v2223_v4  ;;  %1665 = vmatpush1.bf16.msra.mxu1 %v2235_v32  ;;  %v3428_v32 = vsub.s32 3, %v3426_v54 }
 0x7c2   :  { %1626 = vmatprep.subr.bf16.mxu0 %v2228_v31  ;;  %1666 = vmatprep.subr.bf16.mxu1 %v2240_v42 }
 0x7c3   :  { %v1525_v33 = vrot.slane %v1512_v48, %v3428_v32 }
 0x7c5   :  { %1627 = vmatpush1.bf16.msra.mxu0 %v2226_v34  ;;  %1667 = vmatpush1.bf16.msra.mxu1 %v2238_v38 }
 0x7c6   :  { %1628 = vmatprep.subr.bf16.mxu0 %v1614_v0  ;;  %1668 = vmatprep.subr.bf16.mxu1 %v1620_v58  ;;  %v3429_v58 = vsub.s32 2, %v3426_v54 }
 0x7c9   :  { %1629 = vmatpush1.bf16.msra.mxu0 %v1611_v14  ;;  %1669 = vmatpush1.bf16.msra.mxu1 %v1617_v13  ;;  %v1521_v14 = vrot.slane %v1512_v48, %v3429_v58 }
 0x7ca   :  { %2111 = vmatprep.subr.bf16.mxu1 %v2610_v26  ;;  %2091 = vmatprep.subr.bf16.mxu0 %v2610_v26 }
 0x7cc   :  { %2052 = vmatmul.mubr.msk.bf16.vlgmr.msra.gmra.mrb[48].mxu0 %vm242_vm2, %v1530_v17  ;;  %2053 = vmatmul.mubr.msk.bf16.vlgmr.msra.gmra.mrb[48].mxu1 %vm242_vm2, %v1530_v17 }
 0x7cd   :  { %2112 = vmatpush3.bf16.msra.mxu1 %v2244_v16  ;;  %2092 = vmatpush3.bf16.msra.mxu0 %v2247_v52 }
 0x7ce   :  { %2113 = vmatprep.subr.bf16.mxu1 %v2610_v26  ;;  %2093 = vmatprep.subr.bf16.mxu0 %v2610_v26 }
 0x7cf   :  { %2127 = vmatprep.mubr.msk.bf16.mxu1 %vm2611_vm3, %v2610_v26  ;;  %2107 = vmatprep.mubr.msk.bf16.mxu0 %vm2611_vm3, %v2610_v26 }
 0x7d1   :  { %2114 = vmatpush3.bf16.msra.mxu1 %v2245_v27  ;;  %2094 = vmatpush3.bf16.msra.mxu0 %v2249_v10 }
 0x7d2   :  { %2115 = vmatprep.subr.bf16.mxu1 %v2610_v26  ;;  %2095 = vmatprep.subr.bf16.mxu0 %v2610_v26 }
 0x7d5   :  { %2116 = vmatpush3.bf16.msra.mxu1 %v2246_v51  ;;  %2096 = vmatpush3.bf16.msra.mxu0 %v2251_v7 }
 0x7d6   :  { %2117 = vmatprep.subr.bf16.mxu1 %v2610_v26  ;;  %2097 = vmatprep.subr.bf16.mxu0 %v2610_v26 }
 0x7d9   :  { %2118 = vmatpush3.bf16.msra.mxu1 %v2248_v53  ;;  %2098 = vmatpush3.bf16.msra.mxu0 %v2253_v21 }
 0x7da   :  { %2119 = vmatprep.subr.bf16.mxu1 %v2610_v26  ;;  %2099 = vmatprep.subr.bf16.mxu0 %v2610_v26 }
 0x7dd   :  { %2120 = vmatpush3.bf16.msra.mxu1 %v2250_v24  ;;  %2100 = vmatpush3.bf16.msra.mxu0 %v2255_v11 }
 0x7de   :  { %2121 = vmatprep.subr.bf16.mxu1 %v2610_v26  ;;  %2101 = vmatprep.subr.bf16.mxu0 %v2610_v26 }
 0x7e1   :  { %2122 = vmatpush3.bf16.msra.mxu1 %v2252_v63  ;;  %2102 = vmatpush3.bf16.msra.mxu0 %v2257_v29 }
 0x7e2   :  { %2123 = vmatprep.subr.bf16.mxu1 %v2610_v26  ;;  %2103 = vmatprep.subr.bf16.mxu0 %v2610_v26 }
 0x7e5   :  { %2124 = vmatpush3.bf16.msra.mxu1 %v2254_v39  ;;  %2104 = vmatpush3.bf16.msra.mxu0 %v2258_v30 }
 0x7e6   :  { %2125 = vmatprep.subr.bf16.mxu1 %v2610_v26  ;;  %2105 = vmatprep.subr.bf16.mxu0 %v2610_v26 }
 0x7e9   :  { %2126 = vmatpush3.bf16.msra.mxu1 %v2256_v8  ;;  %2106 = vmatpush3.bf16.msra.mxu0 %v2259_v15 }
 0x88f   :  { %v1420_v18 = vpop.f32.mrb[44].mxu0  ;;  %v1461_v12 = vpop.f32.mrb[44].mxu1 }
 0x890   :  { %v1468_v19 = vadd.f32 %v1420_v18, %v3422_v9  ;;  %v1482_v20 = vadd.f32 %v1461_v12, %v3423_v6  ;;  %v1422_v23 = vpop.f32.mrb[45].mxu0  ;;  %v1463_v25 = vpop.f32.mrb[45].mxu1 }
 0x891   :  { %v1475_v22 = vadd.f32 %v1422_v23, %v3424_v35  ;;  %v1484_v57 = vadd.f32 %v1463_v25, %v3425_v47  ;;  %v1424_v5 = vpop.f32.mrb[46].mxu0  ;;  %v1465_v36 = vpop.f32.mrb[46].mxu1  ;;  %v2072_v35 = vld [vmem:[%s3366_s8] ss:$0 sm:$0xff] }
 0x892   :  { %v2033_v50 = vmul.f32 -1.442695, %v1468_v19  ;;  %v1425_v28 = vpop.f32.mrb[47].mxu0  ;;  %v1466_v44 = vpop.f32.mrb[47].mxu1 }
 0x893   :  { %v2034_v45 = vmul.f32 -1.442695, %v1475_v22  ;;  %v2035_v49 = vmul.f32 -1.442695, %v1484_v57 }
 0x894   :  { %2372 = vpow2.f32 %v2033_v50 }
 0x895   :  { %2374 = vpow2.f32 %v2034_v45 }
 0x896   :  { %2376 = vpow2.f32 %v2035_v49 }
 0x897   :  { %2378 = vtanh.f32 %v1482_v20 }
 0x89e   :  { %v2373_v60 = vpop.eup %2372 }
 0x89f   :  { %v2375_v61 = vpop.eup %2374  ;;  %v1472_v62 = vadd.f32 1.0, %v2373_v60  ;;  %v1656_v1 = vpop.f32.mrb[48].mxu0 }
 0x8a0   :  { %v1696_v2 = vpop.f32.mrb[48].mxu1  ;;  %v1479_v3 = vadd.f32 1.0, %v2375_v61  ;;  %v1657_v4 = vadd.f32 %v1656_v1, %v1517_v59  ;;  %v1658_v31 = vpop.f32.mrb[49].mxu0 }
 0x8a1   :  { %v1698_v42 = vpop.f32.mrb[49].mxu1  ;;  %2380 = vrcp.f32 %v1472_v62  ;;  %v1659_v43 = vpop.f32.mrb[50].mxu0  ;;  %v1697_v51 = vadd.f32 %v1696_v2, %v1521_v14 }
 0x8a2   :  { %v1700_v34 = vpop.f32.mrb[50].mxu1  ;;  %2382 = vrcp.f32 %v1479_v3  ;;  %v2054_v37 = vmul.f32 -1.442695, %v1657_v4  ;;  %v1660_v38 = vpop.f32.mrb[51].mxu0  ;;  %v1699_v41 = vadd.f32 %v1698_v42, %v1525_v33 }
 0x8a3   :  { %v1701_v40 = vpop.f32.mrb[51].mxu1  ;;  %v2377_v0 = vpop.eup %2376 }
 0x8a4   :  { %2384 = vpow2.f32 %v2054_v37  ;;  %v2055_v13 = vmul.f32 -1.442695, %v1699_v41  ;;  %v2379_v46 = vpop.eup %2378  ;;  %v1488_v16 = vadd.f32 1.0, %v2377_v0 }
 0x8a6   :  { %2386 = vpow2.f32 %v2055_v13 }
 0x8a7   :  { %2388 = vrcp.f32 %v1488_v16 }
 0x8a8   :  { %2390 = vtanh.f32 %v1697_v51 }
 0x8ab   :  { %v2381_v17 = vpop.eup %2380 }
 0x8ac   :  { %v2383_v26 = vpop.eup %2382  ;;  %v1492_v27 = vmul.f32 %v2381_v17, %v2379_v46 }
 0x8ad   :  { %v1491_v52 = vmul.f32 %v2383_v26, %v3317_v55 }
 0x8ae   :  { %v2385_v53 = vpop.eup %2384 }
 0x8af   :  { %v1493_v10 = vadd.f32 %v1492_v27, %v1491_v52  ;;  %v1706_v24 = vadd.f32 1.0, %v2385_v53 }
 0x8b0   :  { %v2387_v7 = vpop.eup %2386 }
 0x8b1   :  { %2392 = vtanh.f32 %v1493_v10  ;;  %v2389_v63 = vpop.eup %2388  ;;  %v1713_v21 = vadd.f32 1.0, %v2387_v7 }
 0x8b2   :  { %2394 = vrcp.f32 %v1706_v24  ;;  %v2391_v39 = vpop.eup %2390 }
 0x8b3   :  { %2396 = vrcp.f32 %v1713_v21 }
 0x8bb   :  { %v2393_v11 = vpop.eup %2392 }
 0x8bc   :  { %v2395_v8 = vpop.eup %2394  ;;  %v1495_v29 = vmul.f32 %v2393_v11, %v2389_v63 }
 0x8bd   :  { %v1716_v30 = vmul.f32 %v2395_v8, %v2391_v39  ;;  %v2397_v55 = vpop.eup %2396 }
 0x8be   :  { %v1719_v15 = vpack.c.bf16 %v1495_v29, %v1495_v29 }
 0x8bf   :  { %2398 = vtanh.f32 %v1716_v30 }
 0x8c0   :  { %2128 = vmatmul.mubr.bf16.vlgmr.msra.gmra.mrb[52].mxu1 %v1719_v15 }
 0x8c9   :  { %v2399_v18 = vpop.eup %2398 }
 0x8ca   :  { %v1718_v12 = vmul.f32 %v2399_v18, %v2397_v55 }
 0x8cc   :  { %v1736_v9 = vpack.c.bf16 %v1718_v12, %v1718_v12 }
 0x8ce   :  { %2108 = vmatmul.mubr.bf16.vlgmr.msra.gmra.mrb[52].mxu0 %v1736_v9 }
 0x993   :  { %v1923_v19 = vpop.f32.mrb[52].mxu1 }
 0x994   :  { %v2129_v6 = vpop.f32.mrb[53].mxu1 }
 0x995   :  { %v1926_v20 = vpop.f32.mrb[54].mxu1 }
 0x996   :  { %v2130_v23 = vpop.f32.mrb[55].mxu1 }
 0x9a1   :  { %v1835_v25 = vpop.f32.mrb[52].mxu0 }
 0x9a2   :  { %v1924_v22 = vadd.f32 %v1923_v19, %v1835_v25  ;;  %v2109_v47 = vpop.f32.mrb[53].mxu0 }
 0x9a3   :  { %v1838_v57 = vpop.f32.mrb[54].mxu0 }
 0x9a4   :  { %v1936_v5 = vadd.f32 %v2072_v35, %v1924_v22  ;;  %v2110_v36 = vpop.f32.mrb[55].mxu0 }
 0x9a6   :  { %1937 = vst [vmem:[#allocation13] sm:$0xff] %v1936_v5 }
 0x9a7   :  { %2575 = shalt.err (!%p2572_p10)
}
 0x9a8   :  { %s2576_s8 = scalar_lea.hbm %s3367_s9, 128 }
 0x9a9   :  { %p2577_p11 = scmp.ne.s32.totalorder %s3367_s9, %s2576_s8  ;;  %p2580_p12 = scmp.lt.u32.totalorder %s2576_s8, %s3367_s9 }
 0x9ab   :  { %p2582_p13 = pnand %p2580_p12, %p2577_p11 }
 0x9ad   :  { %2585 = shalt.err (!%p2582_p13)
}
 0x9ae   :  { %1947 = dma.vmem_to_hbm [thread:$0]  %s1945_s23, 128, %s3367_s9, [#allocation4]  }
 0x9af   :  { %2594 = dma.done.wait [#allocation4], 128  }
 0x9b0   :  { %2595 = vsyncadd [#allocation4], 4294967168 }
 0x9b1   :  { %1951 = vsyncpa [#allocation3], 1 }
 0x9b2   :  { %1952 = vsyncpa [#allocation6], 1 }
 0x9b3   :  { %1953 = vsyncpa [#allocation9], 1 }
 0x9b4   :  { %1954 = vsyncpa [#allocation12], 1 }
 0x9b5   :  { %1955 = vsyncpa [#allocation4], 1 }

</bundles_post_ra>
